<compile_context>
chip_gen: v6e
topology: v6e:2x2x1
jax: 0.10.0
libtpu: 0.0.40
codegen_flags: <defaults>
</compile_context>

<pallas_src>
import math

import jax
import jax.numpy as jnp
from jax.experimental import pallas as pl
from jax.experimental.pallas import tpu as pltpu

# ----- small ModelConfig -----
DIM = 32          # config.dim
N_HEADS = 4       # config.n_heads
HEAD_DIM = DIM // N_HEADS
HIDDEN = 4 * DIM  # config.hidden_dim
SEQ = 8           # seqlen (== max_seq_len here)
BATCH = 2
EPS = 1e-5        # config.norm_eps
NEG_INF = float(jnp.finfo(jnp.bfloat16).min)  # torch.finfo(torch.bfloat16).min


def tsa_block_kernel(lc_ref, x_ref, xt_ref, cos_ref, sina_ref, sinb_ref,
                     wqkv_ref, wo_ref, w13_ref, w2_ref, o_ref):
    M, D = x_ref.shape            # M = B*S (batch flattened into the matmul M dim)
    D2 = 2 * D
    S = cos_ref.shape[0]
    B = M // S

    x = x_ref[...].astype(jnp.float32)        # (M, D)
    x_tok = xt_ref[...].astype(jnp.float32)   # (M, D)

    # --- TSA lerp: sigmoid(lc) precomputed in the wrapper, read from SMEM ---
    w = lc_ref[0, 0]
    x_attn_in = w * x + (1.0 - w) * x_tok

    # --- RMSNorm1 (gain folded into wqkv) + fused QKV projection (bf16 MXU) ---
    h = x_attn_in * jax.lax.rsqrt(
        jnp.mean(x_attn_in * x_attn_in, axis=-1, keepdims=True) + EPS)
    qkv = jnp.dot(h.astype(jnp.bfloat16), wqkv_ref[...],
                  preferred_element_type=jnp.float32)                   # (M, 3D) f32

    # --- interleaved RoPE on the Q|K slice only ---
    # Tables are (S, 2D); broadcast over batch with a cheap sublane tile in VMEM.
    # sinA is zero on odd columns, sinB zero on even columns, so the wrap-around
    # contributions of both rolls (and the Q<->K boundary) multiply by zero.
    cos_t = jnp.tile(cos_ref[...], (B, 1))                              # (M, 2D)
    sina_t = jnp.tile(sina_ref[...], (B, 1))
    sinb_t = jnp.tile(sinb_ref[...], (B, 1))
    qk = qkv[:, :D2]
    qk = (qk * cos_t
          + pltpu.roll(qk, shift=D2 - 1, axis=1) * sina_t
          + pltpu.roll(qk, shift=1, axis=1) * sinb_t)                   # (M, 2D)
    xv = qkv[:, D2:]                                                    # (M, D)

    # --- causal mask generated in-kernel (no (M, M) HBM input) ---
    row = jax.lax.broadcasted_iota(jnp.int32, (S, S), 0)
    col = jax.lax.broadcasted_iota(jnp.int32, (S, S), 1)
    causal = jnp.where(col <= row, 0.0, NEG_INF)                        # (S, S) f32

    # --- per-batch, per-head attention (no B^2 score work, 2-D dots only) ---
    # NOTE: at toy size HEAD_DIM=8 the per-head slices are not lane-tile aligned;
    # acceptable here, irrelevant once head_dim >= 128.
    scale = 1.0 / math.sqrt(HEAD_DIM)
    batch_outs = []
    for b in range(B):
        r0 = b * S
        qk_b = qk[r0:r0 + S, :]                                         # (S, 2D)
        v_b = xv[r0:r0 + S, :]                                          # (S, D)
        head_outs = []
        for hh in range(N_HEADS):
            c0 = hh * HEAD_DIM
            q_h = qk_b[:, c0:c0 + HEAD_DIM].astype(jnp.bfloat16)        # (S, hd)
            k_h = qk_b[:, D + c0:D + c0 + HEAD_DIM].astype(jnp.bfloat16)
            v_h = v_b[:, c0:c0 + HEAD_DIM].astype(jnp.bfloat16)
            # scores = q @ k^T (contract last dims; no explicit transpose)
            s = jax.lax.dot_general(q_h, k_h, (((1,), (1,)), ((), ())),
                                    preferred_element_type=jnp.float32)  # (S, S)
            s = s * scale + causal
            s = s - jnp.max(s, axis=-1, keepdims=True)
            p = jnp.exp(s)
            p = p * pl.reciprocal(jnp.sum(p, axis=-1, keepdims=True), approx=True)
            head_outs.append(jnp.dot(p.astype(jnp.bfloat16), v_h,
                                     preferred_element_type=jnp.float32))
        batch_outs.append(jnp.concatenate(head_outs, axis=1))           # (S, D)
    attn = jnp.concatenate(batch_outs, axis=0)                          # (M, D) f32

    x1 = x + jnp.dot(attn.astype(jnp.bfloat16), wo_ref[...],
                     preferred_element_type=jnp.float32)

    # --- RMSNorm2 (gain folded into w1|w3) + SwiGLU FFN via fused w1|w3 ---
    h2 = x1 * jax.lax.rsqrt(jnp.mean(x1 * x1, axis=-1, keepdims=True) + EPS)
    gu = jnp.dot(h2.astype(jnp.bfloat16), w13_ref[...],
                 preferred_element_type=jnp.float32)                    # (M, 2*HIDDEN)
    g = gu[:, :HIDDEN]
    u = gu[:, HIDDEN:]
    ff_in = g * jax.nn.sigmoid(g) * u                                   # f32 VPU/EUP
    ff = jnp.dot(ff_in.astype(jnp.bfloat16), w2_ref[...],
                 preferred_element_type=jnp.float32)

    o_ref[...] = (x1 + ff).astype(o_ref.dtype)


def tsa_transformer_block(x, x_token, freqs_cos, freqs_sin, params):
    B, S, D = x.shape
    M = B * S

    # NOTE: at D=32 the (M, D) in/out slabs are not lane-dense (toy-size artifact;
    # fine once D >= 128).
    xf = x.reshape(M, D)
    xtf = x_token.reshape(M, D)

    # sigmoid(lc) hoisted out of the kernel; passed as an SMEM scalar.
    lc_sig = jax.nn.sigmoid(params["lc"]).reshape(1, 1).astype(jnp.float32)

    # Fused projection weights, RMSNorm gains folded into the input rows, stored bf16:
    # (x_norm * g) @ W == x_norm @ (g[:, None] * W).
    g1 = params["n1"].reshape(D, 1)
    g2 = params["n2"].reshape(D, 1)
    wqkv = (g1 * jnp.concatenate([params["wq"], params["wk"], params["wv"]],
                                 axis=1)).astype(jnp.bfloat16)          # (D, 3D)
    w13 = (g2 * jnp.concatenate([params["w1"], params["w3"]],
                                axis=1)).astype(jnp.bfloat16)           # (D, 2*HIDDEN)
    wo = params["wo"].astype(jnp.bfloat16)                              # (D, D)
    w2 = params["w2"].astype(jnp.bfloat16)                              # (HIDDEN, D)

    # Interleaved-RoPE tables for the fused Q|K slice only, shape (S, 2D):
    #   out = v*cos + roll_left(v)*sinA + roll_right(v)*sinB
    #   sinA[2i] = -sin[i], sinA[2i+1] = 0 ; sinB[2i] = 0, sinB[2i+1] = +sin[i]
    cos2 = jnp.repeat(freqs_cos, 2, axis=-1).astype(jnp.float32)        # (S, hd)
    sin2 = jnp.repeat(freqs_sin, 2, axis=-1).astype(jnp.float32)        # (S, hd)
    even = (jnp.arange(HEAD_DIM) % 2 == 0).astype(jnp.float32)
    cos_qk = jnp.tile(cos2, (1, N_HEADS))                               # (S, D)
    sina_qk = jnp.tile(-sin2 * even[None, :], (1, N_HEADS))             # (S, D)
    sinb_qk = jnp.tile(sin2 * (1.0 - even)[None, :], (1, N_HEADS))      # (S, D)
    cos_t = jnp.concatenate([cos_qk, cos_qk], axis=1)                   # (S, 2D)
    sina_t = jnp.concatenate([sina_qk, sina_qk], axis=1)
    sinb_t = jnp.concatenate([sinb_qk, sinb_qk], axis=1)

    # Advisory cost estimate so XLA can schedule/overlap the custom call.
    flops = (2 * M * D * 3 * D                        # fused QKV
             + B * N_HEADS * 4 * S * S * HEAD_DIM     # scores + P@V
             + 2 * M * D * D                          # wo
             + 2 * M * D * 2 * HIDDEN                 # fused w1|w3
             + 2 * M * HIDDEN * D)                    # w2
    transcendentals = (B * N_HEADS * S * S            # exp
                       + B * N_HEADS * S              # approx reciprocal
                       + M * HIDDEN                   # sigmoid (silu)
                       + 2 * M)                       # rsqrt
    bytes_accessed = (4 * (3 * M * D + 3 * S * 2 * D + 1)              # f32 acts/tables
                      + 2 * (D * 3 * D + D * D + D * 2 * HIDDEN + HIDDEN * D))  # bf16 W

    def vmem(shape):
        return pl.BlockSpec(shape, lambda i: (0,) * len(shape))

    out = pl.pallas_call(
        tsa_block_kernel,
        out_shape=jax.ShapeDtypeStruct((M, D), x.dtype),
        grid=(1,),
        in_specs=[
            pl.BlockSpec(memory_space=pltpu.MemorySpace.SMEM),  # sigmoid(lc) scalar
            vmem((M, D)), vmem((M, D)),                         # x, x_token (flattened)
            vmem((S, 2 * D)), vmem((S, 2 * D)), vmem((S, 2 * D)),  # RoPE cos/sinA/sinB
            vmem((D, 3 * D)),                                   # wqkv (bf16, gain-folded)
            vmem((D, D)),                                       # wo   (bf16)
            vmem((D, 2 * HIDDEN)),                              # w1|w3 (bf16, gain-folded)
            vmem((HIDDEN, D)),                                  # w2   (bf16)
        ],
        out_specs=vmem((M, D)),
        compiler_params=pltpu.CompilerParams(
            dimension_semantics=("arbitrary",)),
        cost_estimate=pl.CostEstimate(flops=flops,
                                      transcendentals=transcendentals,
                                      bytes_accessed=bytes_accessed),
    )(lc_sig, xf, xtf, cos_t, sina_t, sinb_t, wqkv, wo, w13, w2)
    return out.reshape(B, S, D)


# ---------------- pure-JAX reference (for correctness check) ----------------
def _rope_ref(v, cos, sin):
    # v: (B, S, H, hd); cos/sin: (S, hd//2) — interleaved llama convention
    vr = v[..., 0::2]
    vi = v[..., 1::2]
    c = cos[None, :, None, :]
    s = sin[None, :, None, :]
    out_r = vr * c - vi * s
    out_i = vr * s + vi * c
    return jnp.stack([out_r, out_i], axis=-1).reshape(v.shape)


def tsa_block_reference(x, x_token, freqs_cos, freqs_sin, p):
    B, S, D = x.shape
    w = jax.nn.sigmoid(p["lc"][0, 0])
    xa = w * x + (1.0 - w) * x_token

    def rms(v, g):
        return v * jax.lax.rsqrt(jnp.mean(v * v, -1, keepdims=True) + EPS) * g

    h = rms(xa, p["n1"][0])
    q = (h @ p["wq"]).reshape(B, S, N_HEADS, HEAD_DIM)
    k = (h @ p["wk"]).reshape(B, S, N_HEADS, HEAD_DIM)
    v = (h @ p["wv"]).reshape(B, S, N_HEADS, HEAD_DIM)
    q = _rope_ref(q, freqs_cos, freqs_sin)
    k = _rope_ref(k, freqs_cos, freqs_sin)
    q, k, v = (t.transpose(0, 2, 1, 3) for t in (q, k, v))
    scores = jnp.einsum("bhqd,bhkd->bhqk", q, k) / math.sqrt(HEAD_DIM)
    causal = jnp.where(jnp.arange(S)[None, :] > jnp.arange(S)[:, None], NEG_INF, 0.0)
    probs = jax.nn.softmax(scores + causal, axis=-1)
    o = jnp.einsum("bhqk,bhkd->bhqd", probs, v).transpose(0, 2, 1, 3).reshape(B, S, D)
    x1 = x + o @ p["wo"]
    h2 = rms(x1, p["n2"][0])
    g = h2 @ p["w1"]
    u = h2 @ p["w3"]
    return x1 + (g * jax.nn.sigmoid(g) * u) @ p["w2"]


def precompute_freqs(head_dim, seq, theta=10000.0):
    freqs = 1.0 / (theta ** (jnp.arange(0, head_dim, 2).astype(jnp.float32) / head_dim))
    t = jnp.arange(seq, dtype=jnp.float32)
    ang = jnp.outer(t, freqs)
    return jnp.cos(ang), jnp.sin(ang)


if __name__ == "__main__":
    key = jax.random.PRNGKey(0)
    ks = jax.random.split(key, 12)

    x = jax.random.normal(ks[0], (BATCH, SEQ, DIM), jnp.float32)
    x_token = jax.random.normal(ks[1], (BATCH, SEQ, DIM), jnp.float32)
    freqs_cos, freqs_sin = precompute_freqs(HEAD_DIM, SEQ)

    wscale = 0.05
    params = {
        "lc": jax.random.normal(ks[2], (1, 1), jnp.float32),        # lc_weight
        # non-trivial RMSNorm gains to exercise the weight-folding path
        "n1": 1.0 + 0.1 * jax.random.normal(ks[10], (1, DIM), jnp.float32),
        "n2": 1.0 + 0.1 * jax.random.normal(ks[11], (1, DIM), jnp.float32),
        # nn.Linear weights stored transposed: (in, out)
        "wq": wscale * jax.random.normal(ks[3], (DIM, DIM), jnp.float32),
        "wk": wscale * jax.random.normal(ks[4], (DIM, DIM), jnp.float32),
        "wv": wscale * jax.random.normal(ks[5], (DIM, DIM), jnp.float32),
        "wo": wscale * jax.random.normal(ks[6], (DIM, DIM), jnp.float32),
        "w1": wscale * jax.random.normal(ks[7], (DIM, HIDDEN), jnp.float32),
        "w2": wscale * jax.random.normal(ks[8], (HIDDEN, DIM), jnp.float32),
        "w3": wscale * jax.random.normal(ks[9], (DIM, HIDDEN), jnp.float32),
    }

    out = tsa_transformer_block(x, x_token, freqs_cos, freqs_sin, params)
    jax.block_until_ready(out)

    ref = tsa_block_reference(x, x_token, freqs_cos, freqs_sin, params)
    err = float(jnp.max(jnp.abs(out - ref)))
    # bf16 matmul operands in the kernel vs. an all-f32 reference
    assert err < 2e-2, f"max abs error vs reference: {err}"

    print("KERNEL_OK")
</pallas_src>

<mosaic_0001>
module attributes {stable_mosaic.version = 11 : i64} {
  func.func @tsa_block_kernel(%arg0: i32, %arg1: memref<1x1xf32, #tpu.memory_space<smem>>, %arg2: memref<16x32xf32, #tpu.memory_space<vmem>>, %arg3: memref<16x32xf32, #tpu.memory_space<vmem>>, %arg4: memref<8x64xf32, #tpu.memory_space<vmem>>, %arg5: memref<8x64xf32, #tpu.memory_space<vmem>>, %arg6: memref<8x64xf32, #tpu.memory_space<vmem>>, %arg7: memref<32x96xbf16, #tpu.memory_space<vmem>>, %arg8: memref<32x32xbf16, #tpu.memory_space<vmem>>, %arg9: memref<32x256xbf16, #tpu.memory_space<vmem>>, %arg10: memref<128x32xbf16, #tpu.memory_space<vmem>>, %arg11: memref<16x32xf32, #tpu.memory_space<vmem>>) attributes {dimension_semantics = [#tpu.dimension_semantics<arbitrary>], iteration_bounds = array<i64: 1>, scalar_prefetch = 0 : i64, scratch_operands = 0 : i64, tpu.core_type = #tpu.core_type<tc>, window_params = [{transform_indices = @transform_0, window_bounds = array<i64: 1, 1>}, {pipeline_mode = #tpu.pipeline_mode<synchronous>, transform_indices = @transform_1, window_bounds = array<i64: 16, 32>}, {pipeline_mode = #tpu.pipeline_mode<synchronous>, transform_indices = @transform_2, window_bounds = array<i64: 16, 32>}, {pipeline_mode = #tpu.pipeline_mode<synchronous>, transform_indices = @transform_3, window_bounds = array<i64: 8, 64>}, {pipeline_mode = #tpu.pipeline_mode<synchronous>, transform_indices = @transform_4, window_bounds = array<i64: 8, 64>}, {pipeline_mode = #tpu.pipeline_mode<synchronous>, transform_indices = @transform_5, window_bounds = array<i64: 8, 64>}, {pipeline_mode = #tpu.pipeline_mode<synchronous>, transform_indices = @transform_6, window_bounds = array<i64: 32, 96>}, {pipeline_mode = #tpu.pipeline_mode<synchronous>, transform_indices = @transform_7, window_bounds = array<i64: 32, 32>}, {pipeline_mode = #tpu.pipeline_mode<synchronous>, transform_indices = @transform_8, window_bounds = array<i64: 32, 256>}, {pipeline_mode = #tpu.pipeline_mode<synchronous>, transform_indices = @transform_9, window_bounds = array<i64: 128, 32>}, {pipeline_mode = #tpu.pipeline_mode<synchronous>, transform_indices = @transform_10, window_bounds = array<i64: 16, 32>}]} {
    %c0 = arith.constant 0 : index
    %c0_0 = arith.constant 0 : index
    %0 = vector.load %arg2[%c0, %c0_0] : memref<16x32xf32, #tpu.memory_space<vmem>>, vector<16x32xf32>
    %c0_1 = arith.constant 0 : index
    %c0_2 = arith.constant 0 : index
    %1 = vector.load %arg3[%c0_1, %c0_2] : memref<16x32xf32, #tpu.memory_space<vmem>>, vector<16x32xf32>
    %c0_3 = arith.constant 0 : index
    %c0_4 = arith.constant 0 : index
    %2 = memref.load %arg1[%c0_3, %c0_4] : memref<1x1xf32, #tpu.memory_space<smem>>
    %3 = vector.broadcast %2 : f32 to vector<16x32xf32>
    %4 = arith.mulf %3, %0 : vector<16x32xf32>
    %cst = arith.constant 1.000000e+00 : f32
    %5 = arith.subf %cst, %2 : f32
    %6 = vector.broadcast %5 : f32 to vector<16x32xf32>
    %7 = arith.mulf %6, %1 : vector<16x32xf32>
    %8 = arith.addf %4, %7 : vector<16x32xf32>
    %9 = arith.mulf %8, %8 : vector<16x32xf32>
    %cst_5 = arith.constant dense<0.000000e+00> : vector<16xf32>
    %10 = vector.multi_reduction <add>, %9, %cst_5 [1] : vector<16x32xf32> to vector<16xf32>
    %11 = vector.shape_cast %10 : vector<16xf32> to vector<16x1xf32>
    %cst_6 = arith.constant 3.200000e+01 : f32
    %12 = vector.broadcast %cst_6 : f32 to vector<16x1xf32>
    %13 = arith.divf %11, %12 : vector<16x1xf32>
    %cst_7 = arith.constant 9.99999974E-6 : f32
    %14 = vector.broadcast %cst_7 : f32 to vector<16x1xf32>
    %15 = arith.addf %13, %14 : vector<16x1xf32>
    %16 = math.rsqrt %15 : vector<16x1xf32>
    %17 = vector.broadcast %16 : vector<16x1xf32> to vector<16x32xf32>
    %18 = arith.mulf %8, %17 : vector<16x32xf32>
    %19 = arith.truncf %18 : vector<16x32xf32> to vector<16x32xbf16>
    %c0_8 = arith.constant 0 : index
    %c0_9 = arith.constant 0 : index
    %20 = vector.load %arg7[%c0_8, %c0_9] : memref<32x96xbf16, #tpu.memory_space<vmem>>, vector<32x96xbf16>
    %cst_10 = arith.constant dense<0.000000e+00> : vector<16x96xf32>
    %21 = tpu.matmul %19, %20, %cst_10 {dimension_numbers = #tpu.dot_dimension_numbers<[1], [0], [0], [1], [0, 0, 1, 1], [], []>} : vector<16x32xbf16>, vector<32x96xbf16>, vector<16x96xf32> -> vector<16x96xf32>
    %c0_11 = arith.constant 0 : index
    %c0_12 = arith.constant 0 : index
    %22 = vector.load %arg4[%c0_11, %c0_12] : memref<8x64xf32, #tpu.memory_space<vmem>>, vector<8x64xf32>
    %23 = tpu.concatenate %22, %22 in 0 : vector<8x64xf32>, vector<8x64xf32> -> vector<16x64xf32>
    %c0_13 = arith.constant 0 : index
    %c0_14 = arith.constant 0 : index
    %24 = vector.load %arg5[%c0_13, %c0_14] : memref<8x64xf32, #tpu.memory_space<vmem>>, vector<8x64xf32>
    %25 = tpu.concatenate %24, %24 in 0 : vector<8x64xf32>, vector<8x64xf32> -> vector<16x64xf32>
    %c0_15 = arith.constant 0 : index
    %c0_16 = arith.constant 0 : index
    %26 = vector.load %arg6[%c0_15, %c0_16] : memref<8x64xf32, #tpu.memory_space<vmem>>, vector<8x64xf32>
    %27 = tpu.concatenate %26, %26 in 0 : vector<8x64xf32>, vector<8x64xf32> -> vector<16x64xf32>
    %28 = vector.extract_strided_slice %21 {offsets = [0, 0], sizes = [16, 64], strides = [1, 1]} : vector<16x96xf32> to vector<16x64xf32>
    %29 = arith.mulf %28, %23 : vector<16x64xf32>
    %c63_i32 = arith.constant 63 : i32
    %30 = tpu.dynamic_rotate %28 by %c63_i32 dim 1 : vector<16x64xf32>, i32 -> vector<16x64xf32>
    %31 = arith.mulf %30, %25 : vector<16x64xf32>
    %32 = arith.addf %29, %31 : vector<16x64xf32>
    %c1_i32 = arith.constant 1 : i32
    %33 = tpu.dynamic_rotate %28 by %c1_i32 dim 1 : vector<16x64xf32>, i32 -> vector<16x64xf32>
    %34 = arith.mulf %33, %27 : vector<16x64xf32>
    %35 = arith.addf %32, %34 : vector<16x64xf32>
    %36 = vector.extract_strided_slice %21 {offsets = [0, 64], sizes = [16, 32], strides = [1, 1]} : vector<16x96xf32> to vector<16x32xf32>
    %37 = tpu.iota {dimensions = array<i32: 0>} : vector<8x8xi32>
    %38 = tpu.iota {dimensions = array<i32: 1>} : vector<8x8xi32>
    %39 = arith.cmpi sle, %38, %37 : vector<8x8xi32>
    %cst_17 = arith.constant 0.000000e+00 : f32
    %cst_18 = arith.constant -3.38953139E+38 : f32
    %40 = vector.broadcast %cst_17 : f32 to vector<8x8xf32>
    %41 = vector.broadcast %cst_18 : f32 to vector<8x8xf32>
    %42 = arith.select %39, %40, %41 : vector<8x8xi1>, vector<8x8xf32>
    %43 = vector.extract_strided_slice %35 {offsets = [0, 0], sizes = [8, 64], strides = [1, 1]} : vector<16x64xf32> to vector<8x64xf32>
    %44 = vector.extract_strided_slice %36 {offsets = [0, 0], sizes = [8, 32], strides = [1, 1]} : vector<16x32xf32> to vector<8x32xf32>
    %45 = vector.extract_strided_slice %43 {offsets = [0, 0], sizes = [8, 8], strides = [1, 1]} : vector<8x64xf32> to vector<8x8xf32>
    %46 = arith.truncf %45 : vector<8x8xf32> to vector<8x8xbf16>
    %47 = vector.extract_strided_slice %43 {offsets = [0, 32], sizes = [8, 8], strides = [1, 1]} : vector<8x64xf32> to vector<8x8xf32>
    %48 = arith.truncf %47 : vector<8x8xf32> to vector<8x8xbf16>
    %49 = vector.extract_strided_slice %44 {offsets = [0, 0], sizes = [8, 8], strides = [1, 1]} : vector<8x32xf32> to vector<8x8xf32>
    %50 = arith.truncf %49 : vector<8x8xf32> to vector<8x8xbf16>
    %cst_19 = arith.constant dense<0.000000e+00> : vector<8x8xf32>
    %51 = tpu.matmul %46, %48, %cst_19 {dimension_numbers = #tpu.dot_dimension_numbers<[1], [1], [0], [0], [0, 0, 1, 0], [], []>} : vector<8x8xbf16>, vector<8x8xbf16>, vector<8x8xf32> -> vector<8x8xf32>
    %cst_20 = arith.constant 0.353553385 : f32
    %52 = vector.broadcast %cst_20 : f32 to vector<8x8xf32>
    %53 = arith.mulf %51, %52 : vector<8x8xf32>
    %54 = arith.addf %53, %42 : vector<8x8xf32>
    %cst_21 = arith.constant dense<0xFF800000> : vector<8xf32>
    %55 = vector.multi_reduction <maximumf>, %54, %cst_21 [1] : vector<8x8xf32> to vector<8xf32>
    %56 = vector.shape_cast %55 : vector<8xf32> to vector<8x1xf32>
    %57 = vector.broadcast %56 : vector<8x1xf32> to vector<8x8xf32>
    %58 = arith.subf %54, %57 : vector<8x8xf32>
    %59 = math.exp %58 : vector<8x8xf32>
    %cst_22 = arith.constant dense<0.000000e+00> : vector<8xf32>
    %60 = vector.multi_reduction <add>, %59, %cst_22 [1] : vector<8x8xf32> to vector<8xf32>
    %61 = vector.shape_cast %60 : vector<8xf32> to vector<8x1xf32>
    %62 = tpu.reciprocal %61 {approx = true} : vector<8x1xf32> -> vector<8x1xf32>
    %63 = vector.broadcast %62 : vector<8x1xf32> to vector<8x8xf32>
    %64 = arith.mulf %59, %63 : vector<8x8xf32>
    %65 = arith.truncf %64 : vector<8x8xf32> to vector<8x8xbf16>
    %cst_23 = arith.constant dense<0.000000e+00> : vector<8x8xf32>
    %66 = tpu.matmul %65, %50, %cst_23 {dimension_numbers = #tpu.dot_dimension_numbers<[1], [0], [0], [1], [0, 0, 1, 1], [], []>} : vector<8x8xbf16>, vector<8x8xbf16>, vector<8x8xf32> -> vector<8x8xf32>
    %67 = vector.extract_strided_slice %43 {offsets = [0, 8], sizes = [8, 8], strides = [1, 1]} : vector<8x64xf32> to vector<8x8xf32>
    %68 = arith.truncf %67 : vector<8x8xf32> to vector<8x8xbf16>
    %69 = vector.extract_strided_slice %43 {offsets = [0, 40], sizes = [8, 8], strides = [1, 1]} : vector<8x64xf32> to vector<8x8xf32>
    %70 = arith.truncf %69 : vector<8x8xf32> to vector<8x8xbf16>
    %71 = vector.extract_strided_slice %44 {offsets = [0, 8], sizes = [8, 8], strides = [1, 1]} : vector<8x32xf32> to vector<8x8xf32>
    %72 = arith.truncf %71 : vector<8x8xf32> to vector<8x8xbf16>
    %cst_24 = arith.constant dense<0.000000e+00> : vector<8x8xf32>
    %73 = tpu.matmul %68, %70, %cst_24 {dimension_numbers = #tpu.dot_dimension_numbers<[1], [1], [0], [0], [0, 0, 1, 0], [], []>} : vector<8x8xbf16>, vector<8x8xbf16>, vector<8x8xf32> -> vector<8x8xf32>
    %cst_25 = arith.constant 0.353553385 : f32
    %74 = vector.broadcast %cst_25 : f32 to vector<8x8xf32>
    %75 = arith.mulf %73, %74 : vector<8x8xf32>
    %76 = arith.addf %75, %42 : vector<8x8xf32>
    %cst_26 = arith.constant dense<0xFF800000> : vector<8xf32>
    %77 = vector.multi_reduction <maximumf>, %76, %cst_26 [1] : vector<8x8xf32> to vector<8xf32>
    %78 = vector.shape_cast %77 : vector<8xf32> to vector<8x1xf32>
    %79 = vector.broadcast %78 : vector<8x1xf32> to vector<8x8xf32>
    %80 = arith.subf %76, %79 : vector<8x8xf32>
    %81 = math.exp %80 : vector<8x8xf32>
    %cst_27 = arith.constant dense<0.000000e+00> : vector<8xf32>
    %82 = vector.multi_reduction <add>, %81, %cst_27 [1] : vector<8x8xf32> to vector<8xf32>
    %83 = vector.shape_cast %82 : vector<8xf32> to vector<8x1xf32>
    %84 = tpu.reciprocal %83 {approx = true} : vector<8x1xf32> -> vector<8x1xf32>
    %85 = vector.broadcast %84 : vector<8x1xf32> to vector<8x8xf32>
    %86 = arith.mulf %81, %85 : vector<8x8xf32>
    %87 = arith.truncf %86 : vector<8x8xf32> to vector<8x8xbf16>
    %cst_28 = arith.constant dense<0.000000e+00> : vector<8x8xf32>
    %88 = tpu.matmul %87, %72, %cst_28 {dimension_numbers = #tpu.dot_dimension_numbers<[1], [0], [0], [1], [0, 0, 1, 1], [], []>} : vector<8x8xbf16>, vector<8x8xbf16>, vector<8x8xf32> -> vector<8x8xf32>
    %89 = vector.extract_strided_slice %43 {offsets = [0, 16], sizes = [8, 8], strides = [1, 1]} : vector<8x64xf32> to vector<8x8xf32>
    %90 = arith.truncf %89 : vector<8x8xf32> to vector<8x8xbf16>
    %91 = vector.extract_strided_slice %43 {offsets = [0, 48], sizes = [8, 8], strides = [1, 1]} : vector<8x64xf32> to vector<8x8xf32>
    %92 = arith.truncf %91 : vector<8x8xf32> to vector<8x8xbf16>
    %93 = vector.extract_strided_slice %44 {offsets = [0, 16], sizes = [8, 8], strides = [1, 1]} : vector<8x32xf32> to vector<8x8xf32>
    %94 = arith.truncf %93 : vector<8x8xf32> to vector<8x8xbf16>
    %cst_29 = arith.constant dense<0.000000e+00> : vector<8x8xf32>
    %95 = tpu.matmul %90, %92, %cst_29 {dimension_numbers = #tpu.dot_dimension_numbers<[1], [1], [0], [0], [0, 0, 1, 0], [], []>} : vector<8x8xbf16>, vector<8x8xbf16>, vector<8x8xf32> -> vector<8x8xf32>
    %cst_30 = arith.constant 0.353553385 : f32
    %96 = vector.broadcast %cst_30 : f32 to vector<8x8xf32>
    %97 = arith.mulf %95, %96 : vector<8x8xf32>
    %98 = arith.addf %97, %42 : vector<8x8xf32>
    %cst_31 = arith.constant dense<0xFF800000> : vector<8xf32>
    %99 = vector.multi_reduction <maximumf>, %98, %cst_31 [1] : vector<8x8xf32> to vector<8xf32>
    %100 = vector.shape_cast %99 : vector<8xf32> to vector<8x1xf32>
    %101 = vector.broadcast %100 : vector<8x1xf32> to vector<8x8xf32>
    %102 = arith.subf %98, %101 : vector<8x8xf32>
    %103 = math.exp %102 : vector<8x8xf32>
    %cst_32 = arith.constant dense<0.000000e+00> : vector<8xf32>
    %104 = vector.multi_reduction <add>, %103, %cst_32 [1] : vector<8x8xf32> to vector<8xf32>
    %105 = vector.shape_cast %104 : vector<8xf32> to vector<8x1xf32>
    %106 = tpu.reciprocal %105 {approx = true} : vector<8x1xf32> -> vector<8x1xf32>
    %107 = vector.broadcast %106 : vector<8x1xf32> to vector<8x8xf32>
    %108 = arith.mulf %103, %107 : vector<8x8xf32>
    %109 = arith.truncf %108 : vector<8x8xf32> to vector<8x8xbf16>
    %cst_33 = arith.constant dense<0.000000e+00> : vector<8x8xf32>
    %110 = tpu.matmul %109, %94, %cst_33 {dimension_numbers = #tpu.dot_dimension_numbers<[1], [0], [0], [1], [0, 0, 1, 1], [], []>} : vector<8x8xbf16>, vector<8x8xbf16>, vector<8x8xf32> -> vector<8x8xf32>
    %111 = vector.extract_strided_slice %43 {offsets = [0, 24], sizes = [8, 8], strides = [1, 1]} : vector<8x64xf32> to vector<8x8xf32>
    %112 = arith.truncf %111 : vector<8x8xf32> to vector<8x8xbf16>
    %113 = vector.extract_strided_slice %43 {offsets = [0, 56], sizes = [8, 8], strides = [1, 1]} : vector<8x64xf32> to vector<8x8xf32>
    %114 = arith.truncf %113 : vector<8x8xf32> to vector<8x8xbf16>
    %115 = vector.extract_strided_slice %44 {offsets = [0, 24], sizes = [8, 8], strides = [1, 1]} : vector<8x32xf32> to vector<8x8xf32>
    %116 = arith.truncf %115 : vector<8x8xf32> to vector<8x8xbf16>
    %cst_34 = arith.constant dense<0.000000e+00> : vector<8x8xf32>
    %117 = tpu.matmul %112, %114, %cst_34 {dimension_numbers = #tpu.dot_dimension_numbers<[1], [1], [0], [0], [0, 0, 1, 0], [], []>} : vector<8x8xbf16>, vector<8x8xbf16>, vector<8x8xf32> -> vector<8x8xf32>
    %cst_35 = arith.constant 0.353553385 : f32
    %118 = vector.broadcast %cst_35 : f32 to vector<8x8xf32>
    %119 = arith.mulf %117, %118 : vector<8x8xf32>
    %120 = arith.addf %119, %42 : vector<8x8xf32>
    %cst_36 = arith.constant dense<0xFF800000> : vector<8xf32>
    %121 = vector.multi_reduction <maximumf>, %120, %cst_36 [1] : vector<8x8xf32> to vector<8xf32>
    %122 = vector.shape_cast %121 : vector<8xf32> to vector<8x1xf32>
    %123 = vector.broadcast %122 : vector<8x1xf32> to vector<8x8xf32>
    %124 = arith.subf %120, %123 : vector<8x8xf32>
    %125 = math.exp %124 : vector<8x8xf32>
    %cst_37 = arith.constant dense<0.000000e+00> : vector<8xf32>
    %126 = vector.multi_reduction <add>, %125, %cst_37 [1] : vector<8x8xf32> to vector<8xf32>
    %127 = vector.shape_cast %126 : vector<8xf32> to vector<8x1xf32>
    %128 = tpu.reciprocal %127 {approx = true} : vector<8x1xf32> -> vector<8x1xf32>
    %129 = vector.broadcast %128 : vector<8x1xf32> to vector<8x8xf32>
    %130 = arith.mulf %125, %129 : vector<8x8xf32>
    %131 = arith.truncf %130 : vector<8x8xf32> to vector<8x8xbf16>
    %cst_38 = arith.constant dense<0.000000e+00> : vector<8x8xf32>
    %132 = tpu.matmul %131, %116, %cst_38 {dimension_numbers = #tpu.dot_dimension_numbers<[1], [0], [0], [1], [0, 0, 1, 1], [], []>} : vector<8x8xbf16>, vector<8x8xbf16>, vector<8x8xf32> -> vector<8x8xf32>
    %133 = tpu.concatenate %66, %88, %110, %132 in 1 : vector<8x8xf32>, vector<8x8xf32>, vector<8x8xf32>, vector<8x8xf32> -> vector<8x32xf32>
    %134 = vector.extract_strided_slice %35 {offsets = [8, 0], sizes = [8, 64], strides = [1, 1]} : vector<16x64xf32> to vector<8x64xf32>
    %135 = vector.extract_strided_slice %36 {offsets = [8, 0], sizes = [8, 32], strides = [1, 1]} : vector<16x32xf32> to vector<8x32xf32>
    %136 = vector.extract_strided_slice %134 {offsets = [0, 0], sizes = [8, 8], strides = [1, 1]} : vector<8x64xf32> to vector<8x8xf32>
    %137 = arith.truncf %136 : vector<8x8xf32> to vector<8x8xbf16>
    %138 = vector.extract_strided_slice %134 {offsets = [0, 32], sizes = [8, 8], strides = [1, 1]} : vector<8x64xf32> to vector<8x8xf32>
    %139 = arith.truncf %138 : vector<8x8xf32> to vector<8x8xbf16>
    %140 = vector.extract_strided_slice %135 {offsets = [0, 0], sizes = [8, 8], strides = [1, 1]} : vector<8x32xf32> to vector<8x8xf32>
    %141 = arith.truncf %140 : vector<8x8xf32> to vector<8x8xbf16>
    %cst_39 = arith.constant dense<0.000000e+00> : vector<8x8xf32>
    %142 = tpu.matmul %137, %139, %cst_39 {dimension_numbers = #tpu.dot_dimension_numbers<[1], [1], [0], [0], [0, 0, 1, 0], [], []>} : vector<8x8xbf16>, vector<8x8xbf16>, vector<8x8xf32> -> vector<8x8xf32>
    %cst_40 = arith.constant 0.353553385 : f32
    %143 = vector.broadcast %cst_40 : f32 to vector<8x8xf32>
    %144 = arith.mulf %142, %143 : vector<8x8xf32>
    %145 = arith.addf %144, %42 : vector<8x8xf32>
    %cst_41 = arith.constant dense<0xFF800000> : vector<8xf32>
    %146 = vector.multi_reduction <maximumf>, %145, %cst_41 [1] : vector<8x8xf32> to vector<8xf32>
    %147 = vector.shape_cast %146 : vector<8xf32> to vector<8x1xf32>
    %148 = vector.broadcast %147 : vector<8x1xf32> to vector<8x8xf32>
    %149 = arith.subf %145, %148 : vector<8x8xf32>
    %150 = math.exp %149 : vector<8x8xf32>
    %cst_42 = arith.constant dense<0.000000e+00> : vector<8xf32>
    %151 = vector.multi_reduction <add>, %150, %cst_42 [1] : vector<8x8xf32> to vector<8xf32>
    %152 = vector.shape_cast %151 : vector<8xf32> to vector<8x1xf32>
    %153 = tpu.reciprocal %152 {approx = true} : vector<8x1xf32> -> vector<8x1xf32>
    %154 = vector.broadcast %153 : vector<8x1xf32> to vector<8x8xf32>
    %155 = arith.mulf %150, %154 : vector<8x8xf32>
    %156 = arith.truncf %155 : vector<8x8xf32> to vector<8x8xbf16>
    %cst_43 = arith.constant dense<0.000000e+00> : vector<8x8xf32>
    %157 = tpu.matmul %156, %141, %cst_43 {dimension_numbers = #tpu.dot_dimension_numbers<[1], [0], [0], [1], [0, 0, 1, 1], [], []>} : vector<8x8xbf16>, vector<8x8xbf16>, vector<8x8xf32> -> vector<8x8xf32>
    %158 = vector.extract_strided_slice %134 {offsets = [0, 8], sizes = [8, 8], strides = [1, 1]} : vector<8x64xf32> to vector<8x8xf32>
    %159 = arith.truncf %158 : vector<8x8xf32> to vector<8x8xbf16>
    %160 = vector.extract_strided_slice %134 {offsets = [0, 40], sizes = [8, 8], strides = [1, 1]} : vector<8x64xf32> to vector<8x8xf32>
    %161 = arith.truncf %160 : vector<8x8xf32> to vector<8x8xbf16>
    %162 = vector.extract_strided_slice %135 {offsets = [0, 8], sizes = [8, 8], strides = [1, 1]} : vector<8x32xf32> to vector<8x8xf32>
    %163 = arith.truncf %162 : vector<8x8xf32> to vector<8x8xbf16>
    %cst_44 = arith.constant dense<0.000000e+00> : vector<8x8xf32>
    %164 = tpu.matmul %159, %161, %cst_44 {dimension_numbers = #tpu.dot_dimension_numbers<[1], [1], [0], [0], [0, 0, 1, 0], [], []>} : vector<8x8xbf16>, vector<8x8xbf16>, vector<8x8xf32> -> vector<8x8xf32>
    %cst_45 = arith.constant 0.353553385 : f32
    %165 = vector.broadcast %cst_45 : f32 to vector<8x8xf32>
    %166 = arith.mulf %164, %165 : vector<8x8xf32>
    %167 = arith.addf %166, %42 : vector<8x8xf32>
    %cst_46 = arith.constant dense<0xFF800000> : vector<8xf32>
    %168 = vector.multi_reduction <maximumf>, %167, %cst_46 [1] : vector<8x8xf32> to vector<8xf32>
    %169 = vector.shape_cast %168 : vector<8xf32> to vector<8x1xf32>
    %170 = vector.broadcast %169 : vector<8x1xf32> to vector<8x8xf32>
    %171 = arith.subf %167, %170 : vector<8x8xf32>
    %172 = math.exp %171 : vector<8x8xf32>
    %cst_47 = arith.constant dense<0.000000e+00> : vector<8xf32>
    %173 = vector.multi_reduction <add>, %172, %cst_47 [1] : vector<8x8xf32> to vector<8xf32>
    %174 = vector.shape_cast %173 : vector<8xf32> to vector<8x1xf32>
    %175 = tpu.reciprocal %174 {approx = true} : vector<8x1xf32> -> vector<8x1xf32>
    %176 = vector.broadcast %175 : vector<8x1xf32> to vector<8x8xf32>
    %177 = arith.mulf %172, %176 : vector<8x8xf32>
    %178 = arith.truncf %177 : vector<8x8xf32> to vector<8x8xbf16>
    %cst_48 = arith.constant dense<0.000000e+00> : vector<8x8xf32>
    %179 = tpu.matmul %178, %163, %cst_48 {dimension_numbers = #tpu.dot_dimension_numbers<[1], [0], [0], [1], [0, 0, 1, 1], [], []>} : vector<8x8xbf16>, vector<8x8xbf16>, vector<8x8xf32> -> vector<8x8xf32>
    %180 = vector.extract_strided_slice %134 {offsets = [0, 16], sizes = [8, 8], strides = [1, 1]} : vector<8x64xf32> to vector<8x8xf32>
    %181 = arith.truncf %180 : vector<8x8xf32> to vector<8x8xbf16>
    %182 = vector.extract_strided_slice %134 {offsets = [0, 48], sizes = [8, 8], strides = [1, 1]} : vector<8x64xf32> to vector<8x8xf32>
    %183 = arith.truncf %182 : vector<8x8xf32> to vector<8x8xbf16>
    %184 = vector.extract_strided_slice %135 {offsets = [0, 16], sizes = [8, 8], strides = [1, 1]} : vector<8x32xf32> to vector<8x8xf32>
    %185 = arith.truncf %184 : vector<8x8xf32> to vector<8x8xbf16>
    %cst_49 = arith.constant dense<0.000000e+00> : vector<8x8xf32>
    %186 = tpu.matmul %181, %183, %cst_49 {dimension_numbers = #tpu.dot_dimension_numbers<[1], [1], [0], [0], [0, 0, 1, 0], [], []>} : vector<8x8xbf16>, vector<8x8xbf16>, vector<8x8xf32> -> vector<8x8xf32>
    %cst_50 = arith.constant 0.353553385 : f32
    %187 = vector.broadcast %cst_50 : f32 to vector<8x8xf32>
    %188 = arith.mulf %186, %187 : vector<8x8xf32>
    %189 = arith.addf %188, %42 : vector<8x8xf32>
    %cst_51 = arith.constant dense<0xFF800000> : vector<8xf32>
    %190 = vector.multi_reduction <maximumf>, %189, %cst_51 [1] : vector<8x8xf32> to vector<8xf32>
    %191 = vector.shape_cast %190 : vector<8xf32> to vector<8x1xf32>
    %192 = vector.broadcast %191 : vector<8x1xf32> to vector<8x8xf32>
    %193 = arith.subf %189, %192 : vector<8x8xf32>
    %194 = math.exp %193 : vector<8x8xf32>
    %cst_52 = arith.constant dense<0.000000e+00> : vector<8xf32>
    %195 = vector.multi_reduction <add>, %194, %cst_52 [1] : vector<8x8xf32> to vector<8xf32>
    %196 = vector.shape_cast %195 : vector<8xf32> to vector<8x1xf32>
    %197 = tpu.reciprocal %196 {approx = true} : vector<8x1xf32> -> vector<8x1xf32>
    %198 = vector.broadcast %197 : vector<8x1xf32> to vector<8x8xf32>
    %199 = arith.mulf %194, %198 : vector<8x8xf32>
    %200 = arith.truncf %199 : vector<8x8xf32> to vector<8x8xbf16>
    %cst_53 = arith.constant dense<0.000000e+00> : vector<8x8xf32>
    %201 = tpu.matmul %200, %185, %cst_53 {dimension_numbers = #tpu.dot_dimension_numbers<[1], [0], [0], [1], [0, 0, 1, 1], [], []>} : vector<8x8xbf16>, vector<8x8xbf16>, vector<8x8xf32> -> vector<8x8xf32>
    %202 = vector.extract_strided_slice %134 {offsets = [0, 24], sizes = [8, 8], strides = [1, 1]} : vector<8x64xf32> to vector<8x8xf32>
    %203 = arith.truncf %202 : vector<8x8xf32> to vector<8x8xbf16>
    %204 = vector.extract_strided_slice %134 {offsets = [0, 56], sizes = [8, 8], strides = [1, 1]} : vector<8x64xf32> to vector<8x8xf32>
    %205 = arith.truncf %204 : vector<8x8xf32> to vector<8x8xbf16>
    %206 = vector.extract_strided_slice %135 {offsets = [0, 24], sizes = [8, 8], strides = [1, 1]} : vector<8x32xf32> to vector<8x8xf32>
    %207 = arith.truncf %206 : vector<8x8xf32> to vector<8x8xbf16>
    %cst_54 = arith.constant dense<0.000000e+00> : vector<8x8xf32>
    %208 = tpu.matmul %203, %205, %cst_54 {dimension_numbers = #tpu.dot_dimension_numbers<[1], [1], [0], [0], [0, 0, 1, 0], [], []>} : vector<8x8xbf16>, vector<8x8xbf16>, vector<8x8xf32> -> vector<8x8xf32>
    %cst_55 = arith.constant 0.353553385 : f32
    %209 = vector.broadcast %cst_55 : f32 to vector<8x8xf32>
    %210 = arith.mulf %208, %209 : vector<8x8xf32>
    %211 = arith.addf %210, %42 : vector<8x8xf32>
    %cst_56 = arith.constant dense<0xFF800000> : vector<8xf32>
    %212 = vector.multi_reduction <maximumf>, %211, %cst_56 [1] : vector<8x8xf32> to vector<8xf32>
    %213 = vector.shape_cast %212 : vector<8xf32> to vector<8x1xf32>
    %214 = vector.broadcast %213 : vector<8x1xf32> to vector<8x8xf32>
    %215 = arith.subf %211, %214 : vector<8x8xf32>
    %216 = math.exp %215 : vector<8x8xf32>
    %cst_57 = arith.constant dense<0.000000e+00> : vector<8xf32>
    %217 = vector.multi_reduction <add>, %216, %cst_57 [1] : vector<8x8xf32> to vector<8xf32>
    %218 = vector.shape_cast %217 : vector<8xf32> to vector<8x1xf32>
    %219 = tpu.reciprocal %218 {approx = true} : vector<8x1xf32> -> vector<8x1xf32>
    %220 = vector.broadcast %219 : vector<8x1xf32> to vector<8x8xf32>
    %221 = arith.mulf %216, %220 : vector<8x8xf32>
    %222 = arith.truncf %221 : vector<8x8xf32> to vector<8x8xbf16>
    %cst_58 = arith.constant dense<0.000000e+00> : vector<8x8xf32>
    %223 = tpu.matmul %222, %207, %cst_58 {dimension_numbers = #tpu.dot_dimension_numbers<[1], [0], [0], [1], [0, 0, 1, 1], [], []>} : vector<8x8xbf16>, vector<8x8xbf16>, vector<8x8xf32> -> vector<8x8xf32>
    %224 = tpu.concatenate %157, %179, %201, %223 in 1 : vector<8x8xf32>, vector<8x8xf32>, vector<8x8xf32>, vector<8x8xf32> -> vector<8x32xf32>
    %225 = tpu.concatenate %133, %224 in 0 : vector<8x32xf32>, vector<8x32xf32> -> vector<16x32xf32>
    %226 = arith.truncf %225 : vector<16x32xf32> to vector<16x32xbf16>
    %c0_59 = arith.constant 0 : index
    %c0_60 = arith.constant 0 : index
    %227 = vector.load %arg8[%c0_59, %c0_60] : memref<32x32xbf16, #tpu.memory_space<vmem>>, vector<32x32xbf16>
    %cst_61 = arith.constant dense<0.000000e+00> : vector<16x32xf32>
    %228 = tpu.matmul %226, %227, %cst_61 {dimension_numbers = #tpu.dot_dimension_numbers<[1], [0], [0], [1], [0, 0, 1, 1], [], []>} : vector<16x32xbf16>, vector<32x32xbf16>, vector<16x32xf32> -> vector<16x32xf32>
    %229 = arith.addf %0, %228 : vector<16x32xf32>
    %230 = arith.mulf %229, %229 : vector<16x32xf32>
    %cst_62 = arith.constant dense<0.000000e+00> : vector<16xf32>
    %231 = vector.multi_reduction <add>, %230, %cst_62 [1] : vector<16x32xf32> to vector<16xf32>
    %232 = vector.shape_cast %231 : vector<16xf32> to vector<16x1xf32>
    %cst_63 = arith.constant 3.200000e+01 : f32
    %233 = vector.broadcast %cst_63 : f32 to vector<16x1xf32>
    %234 = arith.divf %232, %233 : vector<16x1xf32>
    %cst_64 = arith.constant 9.99999974E-6 : f32
    %235 = vector.broadcast %cst_64 : f32 to vector<16x1xf32>
    %236 = arith.addf %234, %235 : vector<16x1xf32>
    %237 = math.rsqrt %236 : vector<16x1xf32>
    %238 = vector.broadcast %237 : vector<16x1xf32> to vector<16x32xf32>
    %239 = arith.mulf %229, %238 : vector<16x32xf32>
    %240 = arith.truncf %239 : vector<16x32xf32> to vector<16x32xbf16>
    %c0_65 = arith.constant 0 : index
    %c0_66 = arith.constant 0 : index
    %241 = vector.load %arg9[%c0_65, %c0_66] : memref<32x256xbf16, #tpu.memory_space<vmem>>, vector<32x256xbf16>
    %cst_67 = arith.constant dense<0.000000e+00> : vector<16x256xf32>
    %242 = tpu.matmul %240, %241, %cst_67 {dimension_numbers = #tpu.dot_dimension_numbers<[1], [0], [0], [1], [0, 0, 1, 1], [], []>} : vector<16x32xbf16>, vector<32x256xbf16>, vector<16x256xf32> -> vector<16x256xf32>
    %243 = vector.extract_strided_slice %242 {offsets = [0, 0], sizes = [16, 128], strides = [1, 1]} : vector<16x256xf32> to vector<16x128xf32>
    %244 = vector.extract_strided_slice %242 {offsets = [0, 128], sizes = [16, 128], strides = [1, 1]} : vector<16x256xf32> to vector<16x128xf32>
    %245 = arith.negf %243 : vector<16x128xf32>
    %246 = math.exp %245 : vector<16x128xf32>
    %cst_68 = arith.constant 1.000000e+00 : f32
    %247 = vector.broadcast %cst_68 : f32 to vector<16x128xf32>
    %248 = arith.addf %247, %246 : vector<16x128xf32>
    %249 = arith.divf %247, %248 : vector<16x128xf32>
    %250 = arith.mulf %243, %249 : vector<16x128xf32>
    %251 = arith.mulf %250, %244 : vector<16x128xf32>
    %252 = arith.truncf %251 : vector<16x128xf32> to vector<16x128xbf16>
    %c0_69 = arith.constant 0 : index
    %c0_70 = arith.constant 0 : index
    %253 = vector.load %arg10[%c0_69, %c0_70] : memref<128x32xbf16, #tpu.memory_space<vmem>>, vector<128x32xbf16>
    %cst_71 = arith.constant dense<0.000000e+00> : vector<16x32xf32>
    %254 = tpu.matmul %252, %253, %cst_71 {dimension_numbers = #tpu.dot_dimension_numbers<[1], [0], [0], [1], [0, 0, 1, 1], [], []>} : vector<16x128xbf16>, vector<128x32xbf16>, vector<16x32xf32> -> vector<16x32xf32>
    %255 = arith.addf %229, %254 : vector<16x32xf32>
    %c0_72 = arith.constant 0 : index
    %c0_73 = arith.constant 0 : index
    %256 = vector.load %arg11[%c0_72, %c0_73] : memref<16x32xf32, #tpu.memory_space<vmem>>, vector<16x32xf32>
    tpu.vector_store %arg11[%c0_72, %c0_73], %255 {strides = array<i32>} : memref<16x32xf32, #tpu.memory_space<vmem>>, vector<16x32xf32>,
    return
  }
  func.func @transform_0(%arg0: i32) -> (i32, i32) {
    %c0_i32 = arith.constant 0 : i32
    %c0_i32_0 = arith.constant 0 : i32
    %c0_i32_1 = arith.constant 0 : i32
    return %c0_i32, %c0_i32_0 : i32, i32
  }
  func.func @transform_1(%arg0: i32) -> (i32, i32) {
    %c0_i32 = arith.constant 0 : i32
    %c0_i32_0 = arith.constant 0 : i32
    %c0_i32_1 = arith.constant 0 : i32
    return %c0_i32, %c0_i32_0 : i32, i32
  }
  func.func @transform_2(%arg0: i32) -> (i32, i32) {
    %c0_i32 = arith.constant 0 : i32
    %c0_i32_0 = arith.constant 0 : i32
    %c0_i32_1 = arith.constant 0 : i32
    return %c0_i32, %c0_i32_0 : i32, i32
  }
  func.func @transform_3(%arg0: i32) -> (i32, i32) {
    %c0_i32 = arith.constant 0 : i32
    %c0_i32_0 = arith.constant 0 : i32
    %c0_i32_1 = arith.constant 0 : i32
    return %c0_i32, %c0_i32_0 : i32, i32
  }
  func.func @transform_4(%arg0: i32) -> (i32, i32) {
    %c0_i32 = arith.constant 0 : i32
    %c0_i32_0 = arith.constant 0 : i32
    %c0_i32_1 = arith.constant 0 : i32
    return %c0_i32, %c0_i32_0 : i32, i32
  }
  func.func @transform_5(%arg0: i32) -> (i32, i32) {
    %c0_i32 = arith.constant 0 : i32
    %c0_i32_0 = arith.constant 0 : i32
    %c0_i32_1 = arith.constant 0 : i32
    return %c0_i32, %c0_i32_0 : i32, i32
  }
  func.func @transform_6(%arg0: i32) -> (i32, i32) {
    %c0_i32 = arith.constant 0 : i32
    %c0_i32_0 = arith.constant 0 : i32
    %c0_i32_1 = arith.constant 0 : i32
    return %c0_i32, %c0_i32_0 : i32, i32
  }
  func.func @transform_7(%arg0: i32) -> (i32, i32) {
    %c0_i32 = arith.constant 0 : i32
    %c0_i32_0 = arith.constant 0 : i32
    %c0_i32_1 = arith.constant 0 : i32
    return %c0_i32, %c0_i32_0 : i32, i32
  }
  func.func @transform_8(%arg0: i32) -> (i32, i32) {
    %c0_i32 = arith.constant 0 : i32
    %c0_i32_0 = arith.constant 0 : i32
    %c0_i32_1 = arith.constant 0 : i32
    return %c0_i32, %c0_i32_0 : i32, i32
  }
  func.func @transform_9(%arg0: i32) -> (i32, i32) {
    %c0_i32 = arith.constant 0 : i32
    %c0_i32_0 = arith.constant 0 : i32
    %c0_i32_1 = arith.constant 0 : i32
    return %c0_i32, %c0_i32_0 : i32, i32
  }
  func.func @transform_10(%arg0: i32) -> (i32, i32) {
    %c0_i32 = arith.constant 0 : i32
    %c0_i32_0 = arith.constant 0 : i32
    %c0_i32_1 = arith.constant 0 : i32
    return %c0_i32, %c0_i32_0 : i32, i32
  }
}

</mosaic_0001>

<bundles_post_ra>
// kernel: tpu_custom_call.1
= control target key start
LH: loop header
LB: loop body
LE: loop exit
PB: predicated region body
PF: predicated region fallthrough
CT: control target
= control target key end

     0   :  { %16 = vsyncpa [#allocation4], 0  ;;  %s2287_s0 = inlined_call_operand.<no memory space> [shape: f32[1,1], index: 0, kind: input, shape index: {}]   ;;  %s2288_s1 = inlined_call_operand.vmem [shape: f32[16,32], index: 1, kind: input, shape index: {}]   ;;  %s2289_s2 = inlined_call_operand.vmem [shape: f32[16,32], index: 2, kind: input, shape index: {}]   ;;  %s2290_s3 = inlined_call_operand.hbm [shape: f32[8,64], index: 3, kind: input, shape index: {}]   ;;  %s2291_s4 = inlined_call_operand.hbm [shape: f32[8,64], index: 4, kind: input, shape index: {}]   ;;  %s2292_s5 = inlined_call_operand.hbm [shape: f32[8,64], index: 5, kind: input, shape index: {}]   ;;  %s2293_s6 = inlined_call_operand.vmem [shape: bf16[32,96], index: 6, kind: input, shape index: {}]   ;;  %s2294_s7 = inlined_call_operand.hbm [shape: bf16[32,32], index: 7, kind: input, shape index: {}]   ;;  %s2295_s8 = inlined_call_operand.vmem [shape: bf16[32,256], index: 8, kind: input, shape index: {}]   ;;  %s2296_s9 = inlined_call_operand.vmem [shape: bf16[128,32], index: 9, kind: input, shape index: {}]   ;;  %s2297_s10 = inlined_call_operand.hbm [shape: f32[16,32], index: 10, kind: output, shape index: {}]  }
   0x1   :  { %17 = vsyncpa [#allocation7], 0 }
   0x2   :  { %18 = vsyncpa [#allocation10], 0 }
   0x3   :  { %19 = vsyncpa [#allocation5], 0  ;;  %s1899_s13 = smov [#allocation6]   ;;  %s1900_s15 = smov [#allocation3]  }
   0x4   :  { %s42_s14 = sshll.u32 %s1899_s13, 4  ;;  %s32_s16 = sshll.u32 %s1900_s15, 4  ;;  %s43_s14 = int_to_ptr.vmem [resolvable:$true] %s42_s14  ;;  %s33_s16 = int_to_ptr.vmem [resolvable:$true] %s32_s16 }
   0x5   :  { %s1799_s17 = scalar_lea.vmem %s43_s14, 128  ;;  %p1804_p1 = scmp.lt.s32.totalorder %s43_s14, %s43_s14 }
   0x6   :  { %p1800_p0 = scmp.ne.s32.totalorder %s43_s14, %s1799_s17  ;;  %p1805_p2 = scmp.lt.s32.totalorder %s1799_s17, %s1799_s17 }
   0x8   :  { %p1806_p3 = por %p1805_p2, %p1804_p1 }
   0xa   :  { %p1807_p4 = pnand %p1806_p3, %p1800_p0 }
   0xc   :  { %1810 = shalt.err (!%p1807_p4)
}
   0xd   :  { %45 = dma.hbm_to_vmem [thread:$0]  %s2291_s4, 128, %s43_s14, [#allocation7]  }
   0xe   :  { %s1819_s20 = scalar_lea.vmem %s33_s16, 128  ;;  %p1824_p6 = scmp.lt.s32.totalorder %s33_s16, %s33_s16 }
   0xf   :  { %p1820_p5 = scmp.ne.s32.totalorder %s33_s16, %s1819_s20  ;;  %p1825_p7 = scmp.lt.s32.totalorder %s1819_s20, %s1819_s20 }
  0x11   :  { %p1826_p8 = por %p1825_p7, %p1824_p6 }
  0x13   :  { %p1827_p9 = pnand %p1826_p8, %p1820_p5 }
  0x15   :  { %1830 = shalt.err (!%p1827_p9)
}
  0x16   :  { %35 = dma.hbm_to_vmem [thread:$0]  %s2290_s3, 128, %s33_s16, [#allocation4]  }
  0x17   :  { %s1901_s23 = smov [#allocation8]   ;;  %s1902_s25 = smov [#allocation9]  }
  0x18   :  { %s52_s24 = sshll.u32 %s1901_s23, 4  ;;  %s63_s26 = sshll.u32 %s1902_s25, 4  ;;  %s53_s24 = int_to_ptr.vmem [resolvable:$true] %s52_s24  ;;  %s64_s26 = int_to_ptr.vmem [resolvable:$true] %s63_s26 }
  0x19   :  { %s1839_s27 = scalar_lea.vmem %s53_s24, 128  ;;  %p1844_p11 = scmp.lt.s32.totalorder %s53_s24, %s53_s24 }
  0x1a   :  { %p1840_p10 = scmp.ne.s32.totalorder %s53_s24, %s1839_s27  ;;  %p1845_p12 = scmp.lt.s32.totalorder %s1839_s27, %s1839_s27 }
  0x1c   :  { %p1846_p13 = por %p1845_p12, %p1844_p11 }
  0x1e   :  { %p1847_p0 = pnand %p1846_p13, %p1840_p10 }
  0x20   :  { %1850 = shalt.err (!%p1847_p0)
}
  0x21   :  { %55 = dma.hbm_to_vmem [thread:$0]  %s2292_s5, 128, %s53_s24, [#allocation7]  }
  0x22   :  { %s1859_s29 = scalar_lea.vmem %s64_s26, 256  ;;  %p1864_p2 = scmp.lt.s32.totalorder %s64_s26, %s64_s26 }
  0x23   :  { %p1860_p1 = scmp.ne.s32.totalorder %s64_s26, %s1859_s29  ;;  %p1865_p3 = scmp.lt.s32.totalorder %s1859_s29, %s1859_s29 }
  0x25   :  { %p1866_p4 = por %p1865_p3, %p1864_p2 }
  0x27   :  { %p1867_p5 = pnand %p1866_p4, %p1860_p1 }
  0x29   :  { %1870 = shalt.err (!%p1867_p5)
}
  0x2a   :  { %s1903_s3 = smov 64   ;;  %s1904_s30 = smov 4  }
  0x2b   :  { %69 = dma.hbm_to_vmem [thread:$0]  %s2294_s7, 256, %s64_s26, [#allocation10], %s1903_s3, %s1903_s3, %s1904_s30  }
  0x2c   :  { %1891 = dma.done.wait [#allocation4], 128  }
  0x2d   :  { %1892 = vsyncadd [#allocation4], 4294967168 }
  0x2e   :  { %1893 = dma.done.wait [#allocation7], 256  }
  0x2f   :  { %1894 = vsyncadd [#allocation7], 4294967040 }
  0x30   :  { %1895 = dma.done.wait [#allocation10], 256  }
  0x31   :  { %1896 = vsyncadd [#allocation10], 4294967040  ;;  %s95_s14 = ssub.f32 1.0, %s2287_s0  ;;  %v92_v0 = vstv %s2287_s0  ;;  %v2006_v2 = vld [vmem:[%s2288_s1] sm:$0xff]  ;;  %v2014_v4 = vld [vmem:[%s2288_s1 + $0x8] sm:$0xff]  ;;  %vm103_vm0 = vcmask 261120  }
  0x32   :  { %v89_v3 = vld [vmem:[%s2289_s2] sm:$0xff]  ;;  %v93_v5 = vmul.f32 %v92_v0, %v2006_v2  ;;  %v90_v7 = vld [vmem:[%s2289_s2 + $0x8] sm:$0xff]  ;;  %v94_v8 = vmul.f32 %v92_v0, %v2014_v4  ;;  %v1905_v17 = vmov 0.0   ;;  %vm1906_vm1 = vmmov 0   ;;  %v182_v35 = vld [vmem:[#allocation8] sm:$0xff]  ;;  %s1908_s25 = smov 63  }
  0x33   :  { %v96_v1 = vstv %s95_s14  ;;  %v1725_v16 = vld [vmem:[%s2293_s6 + $0x8] sm:$0xff]   ;;  %1549 = vmatprep.subr.bf16.mxu0 %v1905_v17  ;;  %1553 = vmatprep.mubr.msk.bf16.mxu0 %vm1906_vm1, %v1905_v17  ;;  %v1726_v18 = vld [vmem:[%s2293_s6] sm:$0xff]   ;;  %s1907_s6 = smov 1   ;;  %vm185_vm2 = vcmask 1048064   ;;  %s1909_s26 = smov 127   ;;  %vm241_vm3 = vcmask 64512  }
  0x34   :  { %v97_v6 = vmul.f32 %v96_v1, %v89_v3  ;;  %v98_v9 = vmul.f32 %v96_v1, %v90_v7  ;;  %1550 = vmatpush3.bf16.msra.mxu0 %v1725_v16  ;;  %1569 = vmatprep.subr.bf16.mxu1 %v1905_v17  ;;  %v181_v34 = vld [vmem:[#allocation6] sm:$0xff]  ;;  %s1910_s27 = smov 65   ;;  %v180_v50 = vld [vmem:[#allocation3] sm:$0xff]  ;;  %s1911_s4 = smov 88   ;;  %vm308_vm5 = vcmask 1043456   ;;  %vm701_vm6 = vcmask 130048  }
  0x35   :  { %1551 = vmatprep.subr.bf16.mxu0 %v1905_v17  ;;  %1571 = vmatprep.mubr.msk.bf16.mxu1 %vm1906_vm1, %v1905_v17  ;;  %s1912_s28 = smov 96   ;;  %s1913_s29 = smov 80   ;;  %vm703_vm7 = vcmask 195584  }
  0x36   :  { %v99_v10 = vadd.f32 %v97_v6, %v93_v5  ;;  %v100_v11 = vadd.f32 %v98_v9, %v94_v8  ;;  %s1914_s30 = smov 120   ;;  %s1915_s11 = smov 72  }
  0x37   :  { %s1916_s12 = smov 112   ;;  %s1917_s5 = smov 104  }
  0x38   :  { %v101_v12 = vmul.f32 %v99_v10, %v99_v10  ;;  %v102_v13 = vmul.f32 %v100_v11, %v100_v11  ;;  %1552 = vmatpush3.bf16.msra.mxu0 %v1726_v18  ;;  %s1919_s13 = smov 56   ;;  %s1920_s14 = smov 48  }
  0x39   :  { %1557 = vmatprep.subr.bf16.mxu0 %v1905_v17  ;;  %s1921_s15 = smov 40   ;;  %s1923_s16 = smov 16  }
  0x3a   :  { %v104_v14 = vsel %vm103_vm0, %v101_v12, 0.0  ;;  %v107_v15 = vsel %vm103_vm0, %v102_v13, 0.0  ;;  %s1924_s17 = smov 24  }
  0x3b   :  { %105 = vadd.xlane.f32.xlu0 %v104_v14 }
  0x3f   :  { %108 = vadd.xlane.f32.xlu0 %v107_v15 }
  0xc4   :  { %v106_v19 = vpop.xlane.xlu0 %105 }
  0xc5   :  { %v111_v20 = vmul.f32 0.03125, %v106_v19 }
  0xc7   :  { %v113_v21 = vadd.f32 1e-05, %v111_v20 }
  0xc8   :  { %v109_v22 = vpop.xlane.xlu0 %108 }
  0xc9   :  { %v112_v23 = vmul.f32 0.03125, %v109_v22  ;;  %1743 = vrsqrt.f32 %v113_v21 }
  0xcb   :  { %v114_v24 = vadd.f32 1e-05, %v112_v23 }
  0xcd   :  { %1745 = vrsqrt.f32 %v114_v24  ;;  %v230_v24 = vlaneseq }
  0xd6   :  { %v1744_v25 = vpop.eup %1743 }
  0xd7   :  { %v117_v27 = vmul.f32 %v1744_v25, %v99_v10  ;;  %v231_v25 = vshrl.u32 %v230_v24, 7 }
  0xda   :  { %v1746_v26 = vpop.eup %1745 }
  0xdb   :  { %v118_v28 = vmul.f32 %v1746_v26, %v100_v11  ;;  %v233_v26 = vand.u32 127, %v230_v24 }
  0xdd   :  { %v119_v29 = vpack.c.bf16 %v118_v28, %v117_v27  ;;  %vm234_vm4 = vcmp.le.s32.totalorder %v233_v26, %v231_v25 }
  0xdf   :  { %1554 = vmatmul.mubr.msk.bf16.vlgmr.msra.gmra.mxu0 %vm103_vm0, %v119_v29  ;;  %v1918_v29 = vmov -3.3895314e+38  }
  0xe0   :  { %1559 = vmatprep.mubr.msk.bf16.mxu0 %vm1906_vm1, %v1905_v17 }
 0x19f   :  { %v2040_v30 = vpop.f32.mrf.mxu0 }
 0x1a0   :  { %186 = vrot.lane.b32.xlu1 %v2040_v30, %s1903_s3  ;;  %v183_v52 = vmul.f32 %v180_v50, %v2040_v30 }
 0x1a1   :  { %v1555_v31 = vpop.f32.mrf.mxu0 }
 0x1a2   :  { %v2096_v31 = vsel %vm234_vm4, 0.0, %v1918_v29 }
 0x1a3   :  { %v2044_v32 = vpop.f32.mrf.mxu0 }
 0x1a4   :  { %189 = vrot.lane.b32.xlu1 %v2044_v32, %s1903_s3  ;;  %v184_v58 = vmul.f32 %v180_v50, %v2044_v32 }
 0x1a5   :  { %v1556_v33 = vpop.f32.mrf.mxu0 }
 0x1a8   :  { %199 = vrot.lane.b32.xlu1 %v181_v34, %s1907_s6 }
 0x1ac   :  { %215 = vrot.lane.b32.xlu1 %v182_v35, %s1908_s25 }
 0x212   :  { %v187_v36 = vpop.permute.xlu1 %186 }
 0x213   :  { %v188_v37 = vsel %vm185_vm2, %v187_v36, %v2040_v30 }
 0x214   :  { %192 = vrot.lane.b32.xlu0 %v188_v37, %s1903_s3 }
 0x216   :  { %v190_v38 = vpop.permute.xlu1 %189 }
 0x217   :  { %v191_v39 = vsel %vm185_vm2, %v190_v38, %v2044_v32 }
 0x218   :  { %194 = vrot.lane.b32.xlu1 %v191_v39, %s1903_s3 }
 0x21a   :  { %v200_v40 = vpop.permute.xlu1 %199 }
 0x21e   :  { %v216_v41 = vpop.permute.xlu1 %215 }
 0x286   :  { %v193_v42 = vpop.permute.xlu0 %192 }
 0x287   :  { %v196_v43 = vsel %vm185_vm2, %v193_v42, %v2040_v30 }
 0x288   :  { %v202_v44 = vmul.f32 %v200_v40, %v196_v43  ;;  %v218_v47 = vmul.f32 %v216_v41, %v196_v43 }
 0x28a   :  { %206 = vrot.lane.b32.xlu1 %v202_v44, %s1909_s26  ;;  %v195_v45 = vpop.permute.xlu1 %194 }
 0x28b   :  { %v197_v46 = vsel %vm185_vm2, %v195_v45, %v2044_v32 }
 0x28c   :  { %v219_v48 = vmul.f32 %v216_v41, %v197_v46  ;;  %v203_v49 = vmul.f32 %v200_v40, %v197_v46 }
 0x28e   :  { %222 = vrot.lane.b32.xlu1 %v218_v47, %s1910_s27  ;;  %224 = vrot.lane.b32.xlu0 %v219_v48, %s1910_s27 }
 0x292   :  { %208 = vrot.lane.b32.xlu1 %v203_v49, %s1909_s26 }
 0x2fc   :  { %v207_v51 = vpop.permute.xlu1 %206 }
 0x2fd   :  { %v212_v53 = vadd.f32 %v207_v51, %v183_v52 }
 0x300   :  { %v223_v54 = vpop.permute.xlu1 %222  ;;  %v225_v60 = vpop.permute.xlu0 %224 }
 0x301   :  { %v228_v55 = vadd.f32 %v223_v54, %v212_v53 }
 0x303   :  { %v236_v56 = vpack.c.bf16 %v228_v55, %v228_v55 }
 0x304   :  { %v209_v57 = vpop.permute.xlu1 %208 }
 0x305   :  { %354 = vrot.lane.b32.xlu0 %v236_v56, %s1911_s4  ;;  %239 = vrot.lane.b32.xlu1 %v236_v56, %s1912_s28  ;;  %v213_v59 = vadd.f32 %v209_v57, %v184_v58 }
 0x307   :  { %v229_v61 = vadd.f32 %v225_v60, %v213_v59 }
 0x309   :  { %466 = vrot.lane.b32.xlu0 %v236_v56, %s1913_s29  ;;  %352 = vrot.lane.b32.xlu1 %v236_v56, %s1914_s30  ;;  %v705_v62 = vpack.c.bf16 %v229_v61, %v229_v61 }
 0x30d   :  { %578 = vrot.lane.b32.xlu0 %v236_v56, %s1915_s11  ;;  %464 = vrot.lane.b32.xlu1 %v236_v56, %s1916_s12 }
 0x311   :  { %576 = vrot.lane.b32.xlu1 %v236_v56, %s1917_s5  ;;  %708 = vrot.lane.b32.xlu0 %v705_v62, %s1912_s28 }
 0x315   :  { %821 = vrot.lane.b32.xlu1 %v705_v62, %s1911_s4  ;;  %819 = vrot.lane.b32.xlu0 %v705_v62, %s1914_s30 }
 0x319   :  { %933 = vrot.lane.b32.xlu1 %v705_v62, %s1913_s29  ;;  %931 = vrot.lane.b32.xlu0 %v705_v62, %s1916_s12 }
 0x31d   :  { %1045 = vrot.lane.b32.xlu1 %v705_v62, %s1915_s11  ;;  %1043 = vrot.lane.b32.xlu0 %v705_v62, %s1917_s5 }
 0x377   :  { %v355_v63 = vpop.permute.xlu0 %354  ;;  %v240_v0 = vpop.permute.xlu1 %239 }
 0x378   :  { %v246_v1 = vsel %vm241_vm3, %v240_v0, 0  ;;  %v360_v3 = vsel %vm241_vm3, %v355_v63, 0 }
 0x379   :  { %1558 = vmatpush3.bf16.xpose.msra.mxu0 %v246_v1  ;;  %1570 = vmatpush3.bf16.xpose.msra.mxu1 %v360_v3 }
 0x37a   :  { %1581 = vmatprep.subr.bf16.mxu1 %v1905_v17  ;;  %1563 = vmatprep.subr.bf16.mxu0 %v1905_v17 }
 0x37b   :  { %v467_v5 = vpop.permute.xlu0 %466  ;;  %v353_v6 = vpop.permute.xlu1 %352 }
 0x37c   :  { %v472_v7 = vsel %vm241_vm3, %v467_v5, 0 }
 0x37f   :  { %v579_v8 = vpop.permute.xlu0 %578  ;;  %v465_v9 = vpop.permute.xlu1 %464 }
 0x380   :  { %1560 = vmatmul.mubr.msk.bf16.vlgmr.msra.gmra.mxu0 %vm241_vm3, %v236_v56  ;;  %1572 = vmatmul.mubr.msk.bf16.vlgmr.msra.gmra.mxu1 %vm241_vm3, %v353_v6  ;;  %v584_v10 = vsel %vm241_vm3, %v579_v8, 0 }
 0x381   :  { %1582 = vmatpush3.bf16.xpose.msra.mxu1 %v472_v7  ;;  %1583 = vmatprep.mubr.msk.bf16.mxu1 %vm1906_vm1, %v1905_v17 }
 0x382   :  { %1593 = vmatprep.subr.bf16.mxu1 %v1905_v17  ;;  %1565 = vmatprep.mubr.msk.bf16.mxu0 %vm1906_vm1, %v1905_v17 }
 0x383   :  { %v709_v11 = vpop.permute.xlu0 %708  ;;  %v577_v12 = vpop.permute.xlu1 %576 }
 0x384   :  { %v714_v13 = vsel %vm241_vm3, %v709_v11, 0 }
 0x387   :  { %v822_v14 = vpop.permute.xlu1 %821  ;;  %v820_v18 = vpop.permute.xlu0 %819 }
 0x388   :  { %1584 = vmatmul.mubr.msk.bf16.vlgmr.msra.gmra.mxu1 %vm241_vm3, %v465_v9  ;;  %v827_v15 = vsel %vm241_vm3, %v822_v14, 0 }
 0x389   :  { %1594 = vmatpush3.bf16.xpose.msra.mxu1 %v584_v10  ;;  %1595 = vmatprep.mubr.msk.bf16.mxu1 %vm1906_vm1, %v1905_v17 }
 0x38a   :  { %1605 = vmatprep.subr.bf16.mxu1 %v1905_v17 }
 0x38b   :  { %v934_v16 = vpop.permute.xlu1 %933  ;;  %v932_v21 = vpop.permute.xlu0 %931 }
 0x38c   :  { %v939_v19 = vsel %vm241_vm3, %v934_v16, 0 }
 0x38f   :  { %v1046_v20 = vpop.permute.xlu1 %1045  ;;  %v1044_v23 = vpop.permute.xlu0 %1043 }
 0x390   :  { %1596 = vmatmul.mubr.msk.bf16.vlgmr.msra.gmra.mxu1 %vm241_vm3, %v577_v12  ;;  %v1051_v22 = vsel %vm241_vm3, %v1046_v20, 0 }
 0x391   :  { %1606 = vmatpush3.bf16.xpose.msra.mxu1 %v714_v13  ;;  %1607 = vmatprep.mubr.msk.bf16.mxu1 %vm1906_vm1, %v1905_v17 }
 0x392   :  { %1617 = vmatprep.subr.bf16.mxu1 %v1905_v17 }
 0x398   :  { %1608 = vmatmul.mubr.msk.bf16.vlgmr.msra.gmra.mxu1 %vm241_vm3, %v705_v62 }
 0x399   :  { %1618 = vmatpush3.bf16.xpose.msra.mxu1 %v827_v15  ;;  %1619 = vmatprep.mubr.msk.bf16.mxu1 %vm1906_vm1, %v1905_v17 }
 0x39a   :  { %1629 = vmatprep.subr.bf16.mxu1 %v1905_v17 }
 0x3a0   :  { %1620 = vmatmul.mubr.msk.bf16.vlgmr.msra.gmra.mxu1 %vm241_vm3, %v820_v18 }
 0x3a1   :  { %1630 = vmatpush3.bf16.xpose.msra.mxu1 %v939_v19  ;;  %1631 = vmatprep.mubr.msk.bf16.mxu1 %vm1906_vm1, %v1905_v17 }
 0x3a2   :  { %1641 = vmatprep.subr.bf16.mxu1 %v1905_v17 }
 0x3a8   :  { %1632 = vmatmul.mubr.msk.bf16.vlgmr.msra.gmra.mxu1 %vm241_vm3, %v932_v21 }
 0x3a9   :  { %1642 = vmatpush3.bf16.xpose.msra.mxu1 %v1051_v22  ;;  %1643 = vmatprep.mubr.msk.bf16.mxu1 %vm1906_vm1, %v1905_v17  ;;  %v237_v22 = vpack.c.bf16 %v2040_v30, %v2040_v30 }
 0x3aa   :  { %1653 = vmatprep.subr.bf16.mxu1 %v1905_v17 }
 0x3b0   :  { %1644 = vmatmul.mubr.msk.bf16.vlgmr.msra.gmra.mxu1 %vm241_vm3, %v1044_v23 }
 0x3b1   :  { %1657 = vmatprep.mubr.msk.bf16.mxu1 %vm1906_vm1, %v1905_v17 }
 0x440   :  { %v282_v27 = vpop.f32.mrf.mxu0  ;;  %v396_v28 = vpop.f32.mrf.mxu1 }
 0x441   :  { %v288_v33 = vmul.f32 0.35355338, %v282_v27  ;;  %v402_v34 = vmul.f32 0.35355338, %v396_v28 }
 0x442   :  { %v1561_v35 = vpop.f32.mrf.mxu0  ;;  %v1573_v36 = vpop.f32.mrf.mxu1 }
 0x443   :  { %v2099_v37 = vadd.f32 %v402_v34, %v2096_v31  ;;  %v2102_v38 = vadd.f32 %v288_v33, %v2096_v31 }
 0x444   :  { %v285_v39 = vpop.f32.mrf.mxu0  ;;  %v399_v40 = vpop.f32.mrf.mxu1 }
 0x445   :  { %v404_v41 = vsel %vm241_vm3, %v2099_v37, -inf  ;;  %v290_v42 = vsel %vm241_vm3, %v2102_v38, -inf }
 0x446   :  { %v1574_v43 = vpop.f32.mrf.mxu1  ;;  %405 = vmax.xlane.f32.xlu0 %v404_v41  ;;  %291 = vmax.xlane.f32.xlu1 %v290_v42  ;;  %v1562_v44 = vpop.f32.mrf.mxu0 }
 0x448   :  { %v508_v45 = vpop.f32.mrf.mxu1 }
 0x449   :  { %v514_v46 = vmul.f32 0.35355338, %v508_v45 }
 0x44a   :  { %v1585_v47 = vpop.f32.mrf.mxu1 }
 0x44b   :  { %v515_v48 = vadd.f32 %v514_v46, %v2096_v31 }
 0x44c   :  { %v511_v49 = vpop.f32.mrf.mxu1 }
 0x44d   :  { %v516_v50 = vsel %vm241_vm3, %v515_v48, -inf }
 0x44e   :  { %v1586_v51 = vpop.f32.mrf.mxu1  ;;  %517 = vmax.xlane.f32.xlu0 %v516_v50 }
 0x450   :  { %v620_v52 = vpop.f32.mrf.mxu1 }
 0x451   :  { %v626_v53 = vmul.f32 0.35355338, %v620_v52 }
 0x452   :  { %v1597_v54 = vpop.f32.mrf.mxu1 }
 0x453   :  { %v627_v55 = vadd.f32 %v626_v53, %v2096_v31 }
 0x454   :  { %v623_v56 = vpop.f32.mrf.mxu1 }
 0x455   :  { %v628_v57 = vsel %vm241_vm3, %v627_v55, -inf }
 0x456   :  { %v1598_v58 = vpop.f32.mrf.mxu1  ;;  %629 = vmax.xlane.f32.xlu1 %v628_v57 }
 0x458   :  { %v750_v59 = vpop.f32.mrf.mxu1 }
 0x459   :  { %v756_v60 = vmul.f32 0.35355338, %v750_v59 }
 0x45a   :  { %v1609_v61 = vpop.f32.mrf.mxu1 }
 0x45b   :  { %v757_v62 = vadd.f32 %v756_v60, %v2096_v31 }
 0x45c   :  { %v753_v63 = vpop.f32.mrf.mxu1 }
 0x45d   :  { %v758_v0 = vsel %vm241_vm3, %v757_v62, -inf }
 0x45e   :  { %759 = vmax.xlane.f32.xlu0 %v758_v0  ;;  %v1610_v1 = vpop.f32.mrf.mxu1 }
 0x460   :  { %v863_v3 = vpop.f32.mrf.mxu1 }
 0x461   :  { %v869_v5 = vmul.f32 0.35355338, %v863_v3 }
 0x462   :  { %v1621_v6 = vpop.f32.mrf.mxu1 }
 0x463   :  { %v2115_v7 = vadd.f32 %v869_v5, %v2096_v31 }
 0x464   :  { %v866_v8 = vpop.f32.mrf.mxu1 }
 0x465   :  { %v871_v9 = vsel %vm241_vm3, %v2115_v7, -inf }
 0x466   :  { %v1622_v10 = vpop.f32.mrf.mxu1  ;;  %872 = vmax.xlane.f32.xlu1 %v871_v9 }
 0x468   :  { %v975_v11 = vpop.f32.mrf.mxu1 }
 0x469   :  { %v981_v12 = vmul.f32 0.35355338, %v975_v11 }
 0x46a   :  { %v1633_v13 = vpop.f32.mrf.mxu1 }
 0x46b   :  { %v982_v14 = vadd.f32 %v981_v12, %v2096_v31 }
 0x46c   :  { %v978_v15 = vpop.f32.mrf.mxu1 }
 0x46d   :  { %v983_v16 = vsel %vm241_vm3, %v982_v14, -inf }
 0x46e   :  { %984 = vmax.xlane.f32.xlu0 %v983_v16  ;;  %v1634_v18 = vpop.f32.mrf.mxu1 }
 0x470   :  { %v1087_v19 = vpop.f32.mrf.mxu1 }
 0x471   :  { %v1093_v24 = vmul.f32 0.35355338, %v1087_v19 }
 0x472   :  { %v1645_v20 = vpop.f32.mrf.mxu1 }
 0x473   :  { %v2126_v25 = vadd.f32 %v1093_v24, %v2096_v31 }
 0x474   :  { %v1090_v21 = vpop.f32.mrf.mxu1 }
 0x475   :  { %v1095_v26 = vsel %vm241_vm3, %v2126_v25, -inf }
 0x476   :  { %v1646_v23 = vpop.f32.mrf.mxu1 }
 0x477   :  { %416 = vrot.lane.b32.xlu1 %v237_v22, %s1919_s13 }
 0x484   :  { %303 = vrot.lane.b32.xlu0 %v237_v22, %s1903_s3 }
 0x49b   :  { %1096 = vmax.xlane.f32.xlu1 %v1095_v26 }
 0x4ac   :  { %528 = vrot.lane.b32.xlu1 %v237_v22, %s1920_s14 }
 0x4cf   :  { %v406_v27 = vpop.xlane.xlu0 %405  ;;  %v292_v28 = vpop.xlane.xlu1 %291 }
 0x4d0   :  { %v407_v30 = vsub.f32 %v2099_v37, %v406_v27  ;;  %v293_v29 = vsub.f32 %v2102_v38, %v292_v28 }
 0x4d2   :  { %v408_v33 = vmul.f32 1.442695, %v407_v30  ;;  %v294_v34 = vmul.f32 1.442695, %v293_v29 }
 0x4d4   :  { %1747 = vpow2.f32 %v408_v33 }
 0x4d5   :  { %1749 = vpow2.f32 %v294_v34 }
 0x4d7   :  { %v518_v35 = vpop.xlane.xlu0 %517 }
 0x4d8   :  { %v519_v31 = vsub.f32 %v515_v48, %v518_v35 }
 0x4da   :  { %v520_v36 = vmul.f32 1.442695, %v519_v31 }
 0x4dc   :  { %1751 = vpow2.f32 %v520_v36 }
 0x4df   :  { %v630_v39 = vpop.xlane.xlu1 %629 }
 0x4e0   :  { %v631_v40 = vsub.f32 %v627_v55, %v630_v39 }
 0x4e1   :  { %v2133_v41 = vpop.eup %1747 }
 0x4e2   :  { %v1750_v42 = vpop.eup %1749  ;;  %v632_v43 = vmul.f32 1.442695, %v631_v40  ;;  %v410_v44 = vsel %vm241_vm3, %v2133_v41, 0.0 }
 0x4e3   :  { %411 = vadd.xlane.f32.xlu1 %v410_v44  ;;  %v296_v37 = vsel %vm241_vm3, %v1750_v42, 0.0 }
 0x4e4   :  { %1753 = vpow2.f32 %v632_v43  ;;  %297 = vadd.xlane.f32.xlu0 %v296_v37 }
 0x4e7   :  { %v760_v38 = vpop.xlane.xlu0 %759 }
 0x4e8   :  { %v761_v45 = vsub.f32 %v757_v62, %v760_v38 }
 0x4e9   :  { %v2138_v46 = vpop.eup %1751 }
 0x4ea   :  { %v762_v47 = vmul.f32 1.442695, %v761_v45  ;;  %v522_v48 = vsel %vm241_vm3, %v2138_v46, 0.0 }
 0x4eb   :  { %523 = vadd.xlane.f32.xlu0 %v522_v48 }
 0x4ec   :  { %1755 = vpow2.f32 %v762_v47 }
 0x4ef   :  { %v873_v58 = vpop.xlane.xlu1 %872 }
 0x4f0   :  { %v874_v59 = vsub.f32 %v2115_v7, %v873_v58  ;;  %v706_v7 = vpack.c.bf16 %v2044_v32, %v2044_v32 }
 0x4f1   :  { %v2142_v49 = vpop.eup %1753 }
 0x4f2   :  { %v634_v50 = vsel %vm241_vm3, %v2142_v49, 0.0  ;;  %v875_v62 = vmul.f32 1.442695, %v874_v59 }
 0x4f3   :  { %635 = vadd.xlane.f32.xlu1 %v634_v50  ;;  %v417_v1 = vpop.permute.xlu1 %416 }
 0x4f4   :  { %v422_v19 = vsel %vm308_vm5, %v417_v1, 0 }
 0x4f7   :  { %v985_v51 = vpop.xlane.xlu0 %984 }
 0x4f8   :  { %v986_v52 = vsub.f32 %v982_v14, %v985_v51 }
 0x4f9   :  { %v2146_v53 = vpop.eup %1755 }
 0x4fa   :  { %v987_v54 = vmul.f32 1.442695, %v986_v52  ;;  %v764_v55 = vsel %vm241_vm3, %v2146_v53, 0.0 }
 0x4fb   :  { %v304_v56 = vpop.permute.xlu0 %303  ;;  %765 = vadd.xlane.f32.xlu1 %v764_v55 }
 0x4fc   :  { %1757 = vpow2.f32 %v987_v54  ;;  %v310_v57 = vsel %vm308_vm5, %v304_v56, 0 }
 0x4fd   :  { %1564 = vmatpush3.bf16.msra.mxu0 %v310_v57  ;;  %1759 = vpow2.f32 %v875_v62 }
 0x4fe   :  { %1575 = vmatprep.subr.bf16.mxu0 %v1905_v17 }
 0x501   :  { %640 = vrot.lane.b32.xlu0 %v237_v22, %s1921_s15 }
 0x509   :  { %v2153_v60 = vpop.eup %1757 }
 0x50a   :  { %v989_v61 = vsel %vm241_vm3, %v2153_v60, 0.0  ;;  %v2157_v63 = vpop.eup %1759 }
 0x50b   :  { %990 = vadd.xlane.f32.xlu1 %v989_v61  ;;  %v877_v0 = vsel %vm241_vm3, %v2157_v63, 0.0 }
 0x520   :  { %878 = vadd.xlane.f32.xlu0 %v877_v0 }
 0x524   :  { %v1097_v3 = vpop.xlane.xlu1 %1096 }
 0x525   :  { %v1098_v5 = vsub.f32 %v2126_v25, %v1097_v3 }
 0x527   :  { %v1099_v6 = vmul.f32 1.442695, %v1098_v5 }
 0x528   :  { %v529_v10 = vpop.permute.xlu1 %528 }
 0x529   :  { %1761 = vpow2.f32 %v1099_v6  ;;  %v534_v23 = vsel %vm308_vm5, %v529_v10, 0 }
 0x536   :  { %v2164_v8 = vpop.eup %1761  ;;  %883 = vrot.lane.b32.xlu0 %v706_v7, %s1919_s13 }
 0x537   :  { %v1101_v9 = vsel %vm241_vm3, %v2164_v8, 0.0 }
 0x538   :  { %1102 = vadd.xlane.f32.xlu1 %v1101_v9 }
 0x53a   :  { %995 = vrot.lane.b32.xlu0 %v706_v7, %s1920_s14 }
 0x53e   :  { %1107 = vrot.lane.b32.xlu0 %v706_v7, %s1921_s15 }
 0x549   :  { %771 = vrot.lane.b32.xlu1 %v706_v7, %s1903_s3  ;;  %s1922_s3 = smov 8  }
 0x56c   :  { %v412_v12 = vpop.xlane.xlu1 %411 }
 0x56d   :  { %v298_v11 = vpop.xlane.xlu0 %297 }
 0x56e   :  { %1763 = vrcp.f32 %v298_v11 }
 0x56f   :  { %1765 = vrcp.f32 %v412_v12 }
 0x574   :  { %v524_v13 = vpop.xlane.xlu0 %523 }
 0x575   :  { %1767 = vrcp.f32 %v524_v13 }
 0x578   :  { %v641_v25 = vpop.permute.xlu0 %640 }
 0x579   :  { %v646_v28 = vsel %vm308_vm5, %v641_v25, 0 }
 0x57b   :  { %v1764_v32 = vpop.eup %1763 }
 0x57c   :  { %v300_v14 = vmul.f32 %v1764_v32, %v1750_v42  ;;  %v1766_v16 = vpop.eup %1765  ;;  %v636_v18 = vpop.xlane.xlu1 %635 }
 0x57d   :  { %1769 = vrcp.f32 %v636_v18  ;;  %v414_v20 = vmul.f32 %v1766_v16, %v2133_v41 }
 0x57e   :  { %v301_v15 = vpack.c.bf16 %v300_v14, %v300_v14  ;;  %v1727_v14 = vld [vmem:[#allocation9 + $0x8] sm:$0xff]  }
 0x57f   :  { %v415_v21 = vpack.c.bf16 %v414_v20, %v414_v20  ;;  %1654 = vmatpush3.bf16.msra.mxu1 %v1727_v14  ;;  %v1740_v14 = vld [vmem:[%s2296_s9 + $0x10] sm:$0xff]  }
 0x580   :  { %1566 = vmatmul.mubr.msk.bf16.vlgmr.msra.gmra.mxu0 %vm241_vm3, %v301_v15  ;;  %1655 = vmatprep.subr.bf16.mxu1 %v1905_v17 }
 0x581   :  { %1576 = vmatpush3.bf16.msra.mxu0 %v422_v19  ;;  %1577 = vmatprep.mubr.msk.bf16.mxu0 %vm1906_vm1, %v1905_v17 }
 0x582   :  { %1587 = vmatprep.subr.bf16.mxu0 %v1905_v17  ;;  %v1768_v22 = vpop.eup %1767 }
 0x583   :  { %v526_v24 = vmul.f32 %v1768_v22, %v2138_v46 }
 0x584   :  { %v766_v33 = vpop.xlane.xlu1 %765 }
 0x585   :  { %v527_v26 = vpack.c.bf16 %v526_v24, %v526_v24  ;;  %1771 = vrcp.f32 %v766_v33 }
 0x588   :  { %1578 = vmatmul.mubr.msk.bf16.vlgmr.msra.gmra.mxu0 %vm241_vm3, %v415_v21  ;;  %v1728_v21 = vld [vmem:[#allocation9] sm:$0xff]  }
 0x589   :  { %1588 = vmatpush3.bf16.msra.mxu0 %v534_v23  ;;  %1589 = vmatprep.mubr.msk.bf16.mxu0 %vm1906_vm1, %v1905_v17 }
 0x58a   :  { %1599 = vmatprep.subr.bf16.mxu0 %v1905_v17  ;;  %v1770_v27 = vpop.eup %1769  ;;  %1656 = vmatpush3.bf16.msra.mxu1 %v1728_v21 }
 0x58b   :  { %v638_v30 = vmul.f32 %v1770_v27, %v2142_v49  ;;  %1661 = vmatprep.subr.bf16.mxu1 %v1905_v17 }
 0x58d   :  { %v639_v29 = vpack.c.bf16 %v638_v30, %v638_v30 }
 0x590   :  { %1590 = vmatmul.mubr.msk.bf16.vlgmr.msra.gmra.mxu0 %vm241_vm3, %v527_v26 }
 0x591   :  { %1600 = vmatpush3.bf16.msra.mxu0 %v646_v28  ;;  %1601 = vmatprep.mubr.msk.bf16.mxu0 %vm1906_vm1, %v1905_v17 }
 0x592   :  { %1611 = vmatprep.subr.bf16.mxu0 %v1905_v17  ;;  %v1772_v31 = vpop.eup %1771 }
 0x593   :  { %v768_v39 = vmul.f32 %v1772_v31, %v2146_v53 }
 0x594   :  { %v991_v35 = vpop.xlane.xlu1 %990 }
 0x595   :  { %v769_v43 = vpack.c.bf16 %v768_v39, %v768_v39 }
 0x598   :  { %1602 = vmatmul.mubr.msk.bf16.vlgmr.msra.gmra.mxu0 %vm241_vm3, %v639_v29 }
 0x599   :  { %1613 = vmatprep.mubr.msk.bf16.mxu0 %vm1906_vm1, %v1905_v17 }
 0x5a9   :  { %v879_v34 = vpop.xlane.xlu0 %878 }
 0x5aa   :  { %1773 = vrcp.f32 %v879_v34 }
 0x5ab   :  { %1775 = vrcp.f32 %v991_v35 }
 0x5ad   :  { %v884_v42 = vpop.permute.xlu0 %883 }
 0x5ae   :  { %v889_v37 = vsel %vm308_vm5, %v884_v42, 0 }
 0x5b1   :  { %v996_v45 = vpop.permute.xlu0 %995 }
 0x5b2   :  { %v1001_v48 = vsel %vm308_vm5, %v996_v45, 0 }
 0x5b5   :  { %v1108_v50 = vpop.permute.xlu0 %1107 }
 0x5b6   :  { %v1113_v53 = vsel %vm308_vm5, %v1108_v50, 0 }
 0x5b7   :  { %v1774_v44 = vpop.eup %1773 }
 0x5b8   :  { %v881_v38 = vmul.f32 %v1774_v44, %v2157_v63  ;;  %v1776_v47 = vpop.eup %1775 }
 0x5b9   :  { %v993_v49 = vmul.f32 %v1776_v47, %v2153_v60 }
 0x5ba   :  { %v882_v46 = vpack.c.bf16 %v881_v38, %v881_v38 }
 0x5bb   :  { %v994_v51 = vpack.c.bf16 %v993_v49, %v993_v49 }
 0x5c1   :  { %v1103_v36 = vpop.xlane.xlu1 %1102 }
 0x5c2   :  { %1777 = vrcp.f32 %v1103_v36 }
 0x5c5   :  { %v772_v40 = vpop.permute.xlu1 %771 }
 0x5c6   :  { %v777_v41 = vsel %vm308_vm5, %v772_v40, 0 }
 0x5c7   :  { %1612 = vmatpush3.bf16.msra.mxu0 %v777_v41 }
 0x5c8   :  { %1623 = vmatprep.subr.bf16.mxu0 %v1905_v17 }
 0x5ca   :  { %1614 = vmatmul.mubr.msk.bf16.vlgmr.msra.gmra.mxu0 %vm241_vm3, %v769_v43 }
 0x5cb   :  { %1624 = vmatpush3.bf16.msra.mxu0 %v889_v37  ;;  %1625 = vmatprep.mubr.msk.bf16.mxu0 %vm1906_vm1, %v1905_v17 }
 0x5cc   :  { %1635 = vmatprep.subr.bf16.mxu0 %v1905_v17 }
 0x5cf   :  { %v1778_v52 = vpop.eup %1777 }
 0x5d0   :  { %v1105_v54 = vmul.f32 %v1778_v52, %v2164_v8 }
 0x5d2   :  { %1626 = vmatmul.mubr.msk.bf16.vlgmr.msra.gmra.mxu0 %vm241_vm3, %v882_v46  ;;  %v1106_v55 = vpack.c.bf16 %v1105_v54, %v1105_v54 }
 0x5d3   :  { %1636 = vmatpush3.bf16.msra.mxu0 %v1001_v48  ;;  %1637 = vmatprep.mubr.msk.bf16.mxu0 %vm1906_vm1, %v1905_v17 }
 0x5d4   :  { %1647 = vmatprep.subr.bf16.mxu0 %v1905_v17 }
 0x5da   :  { %1638 = vmatmul.mubr.msk.bf16.vlgmr.msra.gmra.mxu0 %vm241_vm3, %v994_v51 }
 0x5db   :  { %1648 = vmatpush3.bf16.msra.mxu0 %v1113_v53  ;;  %1649 = vmatprep.mubr.msk.bf16.mxu0 %vm1906_vm1, %v1905_v17 }
 0x5e2   :  { %1650 = vmatmul.mubr.msk.bf16.vlgmr.msra.gmra.mxu0 %vm241_vm3, %v1106_v55 }
 0x640   :  { %v346_v56 = vpop.f32.mrf.mxu0 }
 0x642   :  { %v1567_v57 = vpop.f32.mrf.mxu0 }
 0x644   :  { %v349_v58 = vpop.f32.mrf.mxu0 }
 0x645   :  { %v1731_v58 = vld [vmem:[%s2295_s8 + $0x14] ss:$8 sps:$4 sm:$0xff]  }
 0x646   :  { %v1568_v59 = vpop.f32.mrf.mxu0  ;;  %1289 = vmatprep.subr.bf16.mxu0 %v1731_v58 }
 0x647   :  { %v1925_v59 = vmov 0  }
 0x648   :  { %v458_v60 = vpop.f32.mrf.mxu0  ;;  %1309 = vmatprep.mubr.bf16.mxu0 %v1925_v59 }
 0x64a   :  { %v1579_v61 = vpop.f32.mrf.mxu0 }
 0x64c   :  { %v461_v62 = vpop.f32.mrf.mxu0 }
 0x64e   :  { %v1580_v63 = vpop.f32.mrf.mxu0 }
 0x650   :  { %v570_v0 = vpop.f32.mrf.mxu0 }
 0x652   :  { %v1591_v1 = vpop.f32.mrf.mxu0 }
 0x654   :  { %v573_v3 = vpop.f32.mrf.mxu0 }
 0x656   :  { %v1592_v5 = vpop.f32.mrf.mxu0 }
 0x658   :  { %v682_v6 = vpop.f32.mrf.mxu0 }
 0x65a   :  { %v1603_v7 = vpop.f32.mrf.mxu0 }
 0x65c   :  { %v685_v9 = vpop.f32.mrf.mxu0 }
 0x65e   :  { %v1604_v10 = vpop.f32.mrf.mxu0 }
 0x68a   :  { %v813_v8 = vpop.f32.mrf.mxu0 }
 0x68c   :  { %v1615_v11 = vpop.f32.mrf.mxu0 }
 0x68d   :  { %v1736_v11 = vld [vmem:[%s2296_s9 + $0x30] sm:$0xff]  }
 0x68e   :  { %v816_v12 = vpop.f32.mrf.mxu0 }
 0x68f   :  { %v1737_v12 = vld [vmem:[%s2296_s9 + $0x28] sm:$0xff]  }
 0x690   :  { %v1616_v13 = vpop.f32.mrf.mxu0 }
 0x691   :  { %v1738_v13 = vld [vmem:[%s2296_s9 + $0x20] sm:$0xff]  }
 0x692   :  { %v925_v32 = vpop.f32.mrf.mxu0 }
 0x693   :  { %v1710_v15 = vpack.i.bf16 %v925_v32, %v458_v60  ;;  %v1732_v60 = vld [vmem:[%s2295_s8] ss:$8 sps:$4 sm:$0xff]   ;;  %v1739_v32 = vld [vmem:[%s2296_s9 + $0x18] sm:$0xff]  }
 0x694   :  { %v1627_v16 = vpop.f32.mrf.mxu0 }
 0x695   :  { %1711 = vrot.lane.b32.xlu1 %v1710_v15, %s1922_s3  ;;  %v1741_v15 = vld [vmem:[%s2296_s9 + $0x8] sm:$0xff]   ;;  %v1742_v16 = vld [vmem:[%s2296_s9] sm:$0xff]  }
 0x696   :  { %v928_v18 = vpop.f32.mrf.mxu0 }
 0x698   :  { %v1628_v19 = vpop.f32.mrf.mxu0 }
 0x69a   :  { %v1037_v20 = vpop.f32.mrf.mxu0 }
 0x69b   :  { %v1715_v22 = vpack.i.bf16 %v1037_v20, %v570_v0 }
 0x69c   :  { %v1639_v23 = vpop.f32.mrf.mxu0 }
 0x69d   :  { %1716 = vrot.lane.b32.xlu0 %v1715_v22, %s1923_s16 }
 0x69e   :  { %v1040_v24 = vpop.f32.mrf.mxu0 }
 0x6a0   :  { %v1640_v25 = vpop.f32.mrf.mxu0 }
 0x6a2   :  { %v1149_v26 = vpop.f32.mrf.mxu0 }
 0x6a3   :  { %v1720_v27 = vpack.i.bf16 %v1149_v26, %v682_v6 }
 0x6a4   :  { %v1651_v28 = vpop.f32.mrf.mxu0 }
 0x6a5   :  { %1721 = vrot.lane.b32.xlu1 %v1720_v27, %s1924_s17 }
 0x6a6   :  { %v1152_v30 = vpop.f32.mrf.mxu0 }
 0x6a8   :  { %v1652_v29 = vpop.f32.mrf.mxu0 }
 0x707   :  { %v1712_v33 = vpop.permute.xlu1 %1711 }
 0x708   :  { %v1714_v35 = vunpack.i.h.bf16 %v1712_v33  ;;  %v1713_v31 = vunpack.i.l.bf16 %v1712_v33 }
 0x70a   :  { %v1167_v41 = vsel %vm241_vm3, %v813_v8, %v1714_v35  ;;  %v700_v42 = vsel %vm241_vm3, %v346_v56, %v1713_v31  ;;  %v1735_v8 = vld [vmem:[%s2296_s9 + $0x38] sm:$0xff]   ;;  %s1926_s9 = smov [#allocation11]  }
 0x70b   :  { %s1451_s14 = sshll.u32 %s1926_s9, 4  ;;  %s1452_s14 = int_to_ptr.vmem [resolvable:$true] %s1451_s14 }
 0x70c   :  { %s1871_s15 = scalar_lea.vmem %s1452_s14, 256  ;;  %p1876_p7 = scmp.lt.s32.totalorder %s1452_s14, %s1452_s14 }
 0x70d   :  { %p1872_p6 = scmp.ne.s32.totalorder %s1452_s14, %s1871_s15  ;;  %p1877_p8 = scmp.lt.s32.totalorder %s1871_s15, %s1871_s15 }
 0x70f   :  { %v1717_v34 = vpop.permute.xlu0 %1716  ;;  %p1878_p9 = por %p1877_p8, %p1876_p7 }
 0x710   :  { %v1719_v36 = vunpack.i.h.bf16 %v1717_v34  ;;  %v1718_v39 = vunpack.i.l.bf16 %v1717_v34 }
 0x711   :  { %p1879_p10 = pnand %p1878_p9, %p1872_p6 }
 0x712   :  { %v1168_v37 = vsel %vm701_vm6, %v1167_v41, %v1719_v36  ;;  %v702_v38 = vsel %vm701_vm6, %v700_v42, %v1718_v39 }
 0x717   :  { %v1722_v40 = vpop.permute.xlu1 %1721 }
 0x718   :  { %v1724_v43 = vunpack.i.h.bf16 %v1722_v40  ;;  %v1723_v44 = vunpack.i.l.bf16 %v1722_v40 }
 0x71a   :  { %v1169_v45 = vsel %vm703_vm7, %v1168_v37, %v1724_v43  ;;  %v704_v46 = vsel %vm703_vm7, %v702_v38, %v1723_v44 }
 0x71b   :  { %v1170_v47 = vpack.c.bf16 %v1169_v45, %v704_v46 }
 0x71d   :  { %1658 = vmatmul.mubr.msk.bf16.vlgmr.msra.gmra.mxu1 %vm103_vm0, %v1170_v47 }
 0x71e   :  { %1677 = vmatprep.mubr.msk.bf16.mxu1 %vm1906_vm1, %v1905_v17  ;;  %1662 = vmatpush3.bf16.msra.mxu1 %v1735_v8 }
 0x71f   :  { %1663 = vmatprep.subr.bf16.mxu1 %v1905_v17 }
 0x722   :  { %1664 = vmatpush3.bf16.msra.mxu1 %v1736_v11 }
 0x723   :  { %1665 = vmatprep.subr.bf16.mxu1 %v1905_v17 }
 0x726   :  { %1666 = vmatpush3.bf16.msra.mxu1 %v1737_v12 }
 0x727   :  { %1667 = vmatprep.subr.bf16.mxu1 %v1905_v17 }
 0x72a   :  { %1668 = vmatpush3.bf16.msra.mxu1 %v1738_v13 }
 0x72b   :  { %1669 = vmatprep.subr.bf16.mxu1 %v1905_v17 }
 0x72e   :  { %1670 = vmatpush3.bf16.msra.mxu1 %v1739_v32 }
 0x72f   :  { %1671 = vmatprep.subr.bf16.mxu1 %v1905_v17 }
 0x732   :  { %1672 = vmatpush3.bf16.msra.mxu1 %v1740_v14 }
 0x733   :  { %1673 = vmatprep.subr.bf16.mxu1 %v1905_v17 }
 0x736   :  { %1674 = vmatpush3.bf16.msra.mxu1 %v1741_v15 }
 0x737   :  { %1675 = vmatprep.subr.bf16.mxu1 %v1905_v17 }
 0x73a   :  { %1676 = vmatpush3.bf16.msra.mxu1 %v1742_v16 }
 0x7dd   :  { %v1224_v48 = vpop.f32.mrf.mxu1 }
 0x7de   :  { %v2222_v49 = vadd.f32 %v1224_v48, %v2006_v2  ;;  %v1729_v2 = vld [vmem:[%s2295_s8 + $0x10] ss:$8 sps:$4 sm:$0xff]  }
 0x7df   :  { %v1659_v50 = vpop.f32.mrf.mxu1  ;;  %1290 = vmatpush1.bf16.msra.mxu0 %v1729_v2 }
 0x7e0   :  { %v1233_v51 = vmul.f32 %v2222_v49, %v2222_v49 }
 0x7e1   :  { %v1227_v52 = vpop.f32.mrf.mxu1 }
 0x7e2   :  { %v2227_v53 = vadd.f32 %v1227_v52, %v2014_v4  ;;  %v1235_v54 = vsel %vm103_vm0, %v1233_v51, 0.0  ;;  %v1734_v4 = vld [vmem:[%s2295_s8 + $0x4] ss:$8 sps:$4 sm:$0xff]  }
 0x7e3   :  { %1236 = vadd.xlane.f32.xlu0 %v1235_v54  ;;  %v1660_v55 = vpop.f32.mrf.mxu1  ;;  %1291 = vmatprep.subr.bf16.mxu0 %v1734_v4 }
 0x7e4   :  { %v1234_v56 = vmul.f32 %v2227_v53, %v2227_v53  ;;  %1292 = vmatpush1.bf16.msra.mxu0 %v1732_v60 }
 0x7e6   :  { %v1238_v57 = vsel %vm103_vm0, %v1234_v56, 0.0 }
 0x7e7   :  { %1239 = vadd.xlane.f32.xlu1 %v1238_v57 }
 0x86c   :  { %v1237_v61 = vpop.xlane.xlu0 %1236 }
 0x86d   :  { %v1241_v62 = vmul.f32 0.03125, %v1237_v61 }
 0x86f   :  { %v1243_v63 = vadd.f32 1e-05, %v1241_v62 }
 0x870   :  { %v1240_v0 = vpop.xlane.xlu1 %1239 }
 0x871   :  { %v1242_v1 = vmul.f32 0.03125, %v1240_v0  ;;  %1779 = vrsqrt.f32 %v1243_v63 }
 0x873   :  { %v1244_v3 = vadd.f32 1e-05, %v1242_v1 }
 0x875   :  { %1781 = vrsqrt.f32 %v1244_v3 }
 0x87e   :  { %v1780_v5 = vpop.eup %1779 }
 0x87f   :  { %v1247_v7 = vmul.f32 %v1780_v5, %v2222_v49 }
 0x882   :  { %v1782_v6 = vpop.eup %1781 }
 0x883   :  { %v1248_v9 = vmul.f32 %v1782_v6, %v2227_v53 }
 0x885   :  { %v1249_v10 = vpack.c.bf16 %v1248_v9, %v1247_v7 }
 0x887   :  { %1491 = vmatmul.mubr.msk.bf16.vlgmr.msra.gmra.mxu0 %vm103_vm0, %v1249_v10 }
 0x947   :  { %v1311_v18 = vpop.f32.mrf.mxu0 }
 0x948   :  { %v1492_v19 = vmul.f32 -1.442695, %v1311_v18 }
 0x949   :  { %v1313_v20 = vpop.f32.mrf.mxu0 }
 0x94a   :  { %1783 = vpow2.f32 %v1492_v19 }
 0x94b   :  { %v1315_v21 = vpop.f32.mrf.mxu0 }
 0x94c   :  { %v1493_v22 = vmul.f32 -1.442695, %v1315_v21 }
 0x94d   :  { %v1317_v29 = vpop.f32.mrf.mxu0 }
 0x94e   :  { %1785 = vpow2.f32 %v1493_v22 }
 0x957   :  { %v1784_v23 = vpop.eup %1783 }
 0x958   :  { %v1326_v24 = vadd.f32 1.0, %v1784_v23 }
 0x95a   :  { %1787 = vrcp.f32 %v1326_v24 }
 0x95b   :  { %v1786_v25 = vpop.eup %1785 }
 0x95c   :  { %v1327_v26 = vadd.f32 1.0, %v1786_v25 }
 0x95e   :  { %1789 = vrcp.f32 %v1327_v26 }
 0x967   :  { %v1788_v27 = vpop.eup %1787 }
 0x968   :  { %v1332_v17 = vmul.f32 %v1788_v27, %v1311_v18 }
 0x96a   :  { %v1334_v33 = vmul.f32 %v1332_v17, %v1313_v20 }
 0x96b   :  { %v1790_v28 = vpop.eup %1789 }
 0x96c   :  { %v1333_v30 = vmul.f32 %v1790_v28, %v1315_v21 }
 0x96e   :  { %v1335_v34 = vmul.f32 %v1333_v30, %v1317_v29 }
 0x970   :  { %v1336_v35 = vpack.c.bf16 %v1335_v34, %v1334_v33 }
 0x972   :  { %1678 = vmatmul.mubr.bf16.vlgmr.msra.gmra.mxu1 %v1336_v35 }
 0xa32   :  { %v1435_v31 = vpop.f32.mrf.mxu1 }
 0xa33   :  { %v1442_v36 = vadd.f32 %v1435_v31, %v2222_v49 }
 0xa34   :  { %v1679_v39 = vpop.f32.mrf.mxu1 }
 0xa35   :  { %1444 = vst.msk [vmem:[#allocation11] sm:$0xff] %vm103_vm0, %v1442_v36 }
 0xa36   :  { %v1438_v40 = vpop.f32.mrf.mxu1 }
 0xa37   :  { %v1443_v41 = vadd.f32 %v1438_v40, %v2227_v53 }
 0xa38   :  { %v1680_v42 = vpop.f32.mrf.mxu1 }
 0xa39   :  { %1445 = vst.msk [vmem:[#allocation11 + $0x8] sm:$0xff] %vm103_vm0, %v1443_v41 }
 0xa3a   :  { %1882 = shalt.err (!%p1879_p10)
}
 0xa3b   :  { %s1927_s16 = smov 128  }
 0xa3c   :  { %1457 = dma.vmem_to_hbm [thread:$0]  %s1452_s14, 256, %s2297_s10, [#allocation5], %s1927_s16, %s1927_s16, %s1922_s3  }
 0xa3d   :  { %1897 = dma.done.wait [#allocation5], 256  }
 0xa3e   :  { %1898 = vsyncadd [#allocation5], 4294967040 }
 0xa3f   :  { %1461 = vsyncpa [#allocation4], 1 }
 0xa40   :  { %1462 = vsyncpa [#allocation7], 1 }
 0xa41   :  { %1463 = vsyncpa [#allocation10], 1 }
 0xa42   :  { %1464 = vsyncpa [#allocation5], 1 }

</bundles_post_ra>
